<compile_context>
chip_gen: v5e
topology: v5e:2x2
jax: 0.10.0
libtpu: 0.0.40
codegen_flags: <defaults>
</compile_context>

<pallas_src>
import math
import functools

import jax
import jax.numpy as jnp
from jax import lax
from jax.experimental import pallas as pl
from jax.experimental.pallas import tpu as pltpu

PREC = jax.lax.Precision.HIGHEST


# ----------------------------- kernel ---------------------------------------


def _layernorm(x, gamma, beta, eps=1e-5):
    mu = jnp.mean(x, axis=-1, keepdims=True)
    var = jnp.mean((x - mu) ** 2, axis=-1, keepdims=True)
    return (x - mu) / jnp.sqrt(var + eps) * gamma + beta


def _adapter_kernel(num_heads, num_queries,
                    x_ref,       # (1, Bt*L, Din)
                    h_ref,       # (1, Bt, D)
                    pe_ref,      # (Bt*L, D)   structure PE, tiled per batch element
                    vecs_ref,    # (13 + 2Q, D) packed biases / LN params / queries / query PE
                    w1_ref,      # (Din, D)    linear_proj
                    wkv_ref,     # (D, 2D)     packed K|V in-proj
                    wstack_ref,  # (D, 4D)     [question_proj | Wq*scale | attn out_proj | output_proj]
                    o_ref):      # (1, Bt, Q*D)
    H, Q = num_heads, num_queries
    D = w1_ref.shape[1]
    Dh = D // H
    Bt = h_ref.shape[1]
    KL = x_ref.shape[1]            # Bt * L
    L = KL // Bt
    QB = Q * Bt                    # query rows, query-major (row = q*Bt + b)
    R = H * QB                     # merged-head rows (row = h*QB + q*Bt + b)

    vecs = vecs_ref[...]
    b1, g1, be1 = vecs[0:1], vecs[1:2], vecs[2:3]
    bqp, g2, be2 = vecs[3:4], vecs[4:5], vecs[5:6]
    bq, bk, bv = vecs[6:7], vecs[7:8], vecs[8:9]
    bo, g3, be3 = vecs[9:10], vecs[10:11], vecs[11:12]
    bout = vecs[12:13]
    lq = vecs[13:13 + Q]                 # (Q, D) learnable queries
    pe_q = vecs[13 + Q:13 + 2 * Q]       # (Q, D) even-position PE

    ws = wstack_ref[...]
    wqp, wq = ws[:, 0:D], ws[:, D:2 * D]
    wo, wout = ws[:, 2 * D:3 * D], ws[:, 3 * D:4 * D]

    # ---- structure path: linear_proj -> layer_norm1 -> + positional encoding
    x = x_ref[0]                                                     # (Bt*L, Din)
    xp = jnp.dot(x, w1_ref[...], precision=PREC,
                 preferred_element_type=jnp.float32) + b1
    xp = _layernorm(xp, g1, be1) + pe_ref[...]                       # (Bt*L, D)

    # ---- packed K|V projection: one lane-dense matmul for all heads
    kv = jnp.dot(xp, wkv_ref[...], precision=PREC,
                 preferred_element_type=jnp.float32)
    kv = kv + jnp.concatenate([bk, bv], axis=-1)                     # (Bt*L, 2D)
    k = kv[:, :D]
    v = kv[:, D:]

    # ---- query path (rows stored query-major: row index = q*Bt + b)
    h = h_ref[0]                                                     # (Bt, D)
    hq = jnp.dot(h, wqp, precision=PREC,
                 preferred_element_type=jnp.float32) + bqp           # (Bt, D)
    hq_rep = jnp.concatenate([hq] * Q, axis=0)                       # (QB, D)
    lq_rep = jnp.concatenate(
        [jnp.broadcast_to(lq[qi:qi + 1, :], (Bt, D)) for qi in range(Q)], axis=0)
    pe_q_rep = jnp.concatenate(
        [jnp.broadcast_to(pe_q[qi:qi + 1, :], (Bt, D)) for qi in range(Q)], axis=0)
    q = _layernorm(lq_rep + hq_rep, g2, be2) + pe_q_rep              # (QB, D)
    # Q in-projection; the 1/sqrt(Dh) softmax scale is folded into wq / bq.
    qp = jnp.dot(q, wq, precision=PREC,
                 preferred_element_type=jnp.float32) + bq            # (QB, D)

    # ---- merged-head attention: replicate qp H times along sublanes, zero the
    #      lanes outside each head, and do ONE score matmul (contraction = D) and
    #      ONE PV matmul (contraction = Bt*L) for all heads and batch elements.
    lane = lax.broadcasted_iota(jnp.int32, (QB, D), 1)
    sel_parts = []                                                   # per-head (QB, D) lane masks
    q_parts = []
    for hd in range(H):
        sel = ((lane >= hd * Dh) & (lane < (hd + 1) * Dh)).astype(jnp.float32)
        sel_parts.append(sel)
        q_parts.append(qp * sel)
    q_all = jnp.concatenate(q_parts, axis=0)                         # (R, D)

    s = lax.dot_general(q_all, k, (((1,), (1,)), ((), ())),
                        precision=PREC,
                        preferred_element_type=jnp.float32)          # (R, Bt*L)

    if Bt > 1:
        # block-diagonal additive mask (cross-attention stays per batch element),
        # generated in-kernel; compiled out entirely when the tile has one batch.
        rb = lax.broadcasted_iota(jnp.int32, (Bt, KL), 0)            # local batch of query row
        cb = lax.broadcasted_iota(jnp.int32, (Bt, KL), 1) // L       # batch of key column
        bias_small = jnp.where(rb == cb, 0.0, -1e30).astype(jnp.float32)
        s = s + jnp.concatenate([bias_small] * (H * Q), axis=0)      # (R, Bt*L)

    s = s - jnp.max(s, axis=-1, keepdims=True)
    p = jnp.exp(s)
    p = p / jnp.sum(p, axis=-1, keepdims=True)                       # exact softmax

    o_heads = jnp.dot(p, v, precision=PREC,
                      preferred_element_type=jnp.float32)            # (R, D)
    # lane-mask + sum the H row-blocks back into the head-concatenated (QB, D) output
    o_all = o_heads[0:QB] * sel_parts[0]
    for hd in range(1, H):
        o_all = o_all + o_heads[hd * QB:(hd + 1) * QB] * sel_parts[hd]

    # ---- attention out_proj -> layer_norm3 -> output_proj
    attn = jnp.dot(o_all, wo, precision=PREC,
                   preferred_element_type=jnp.float32) + bo
    attn = _layernorm(attn, g3, be3)
    out = jnp.dot(attn, wout, precision=PREC,
                  preferred_element_type=jnp.float32) + bout         # (QB, D)

    # ---- lane-dense store: (Bt, Q*D) tile built with static slices + lane concat
    o_ref[0] = jnp.concatenate(
        [out[qi * Bt:(qi + 1) * Bt, :] for qi in range(Q)], axis=-1)


# ----------------------------- glue / wrapper --------------------------------


def positional_encoding(d_model, max_len):
    position = jnp.arange(max_len, dtype=jnp.float32)[:, None]
    div_term = jnp.exp(jnp.arange(0, d_model, 2, dtype=jnp.float32)
                       * (-math.log(10000.0) / d_model))
    pe = jnp.zeros((max_len, d_model), jnp.float32)
    pe = pe.at[:, 0::2].set(jnp.sin(position * div_term))
    pe = pe.at[:, 1::2].set(jnp.cos(position * div_term))
    return pe


def init_params(key, input_dim, output_dim, num_queries):
    ks = jax.random.split(key, 24)
    rnd = lambda k, shape, scale=0.1: scale * jax.random.normal(k, shape, jnp.float32)
    D = output_dim
    return dict(
        w1=rnd(ks[0], (input_dim, D)), b1=rnd(ks[1], (1, D)),
        g1=1.0 + rnd(ks[2], (1, D)), be1=rnd(ks[3], (1, D)),
        lq=jax.random.normal(ks[4], (num_queries, D), jnp.float32),
        wqp=rnd(ks[5], (D, D)), bqp=rnd(ks[6], (1, D)),
        g2=1.0 + rnd(ks[7], (1, D)), be2=rnd(ks[8], (1, D)),
        w_in=rnd(ks[9], (D, 3 * D)), b_in=rnd(ks[10], (1, 3 * D)),   # packed Wq|Wk|Wv
        wo=rnd(ks[11], (D, D)), bo=rnd(ks[12], (1, D)),
        g3=1.0 + rnd(ks[13], (1, D)), be3=rnd(ks[14], (1, D)),
        wout=rnd(ks[15], (D, D)), bout=rnd(ks[16], (1, D)),
    )


def protein_adapter_forward(x, h_state, params, *, num_heads, num_queries,
                            max_len, block_b=None):
    B, S, Din = x.shape
    D = params["w1"].shape[1]
    H, Q = num_heads, num_queries
    Dh = D // H

    # pad / truncate the structure sequence to max_len (pure-JAX glue, matches PyTorch)
    if S < max_len:
        x = jnp.pad(x, ((0, 0), (0, max_len - S), (0, 0)))
    elif S > max_len:
        x = x[:, :max_len, :]
    L = max_len

    # --- batch tile selection ---------------------------------------------------
    # Target ~1024 fused structure rows (Bt*L) per grid step so the ~0.35 us fixed
    # per-step cost is amortized, but cap Bt at 64: the block-diagonal batch fusion
    # wastes (Bt-1)/Bt of the attention math and the score/exp temporaries grow as
    # Bt^2 (v7x only has 64 MiB VMEM).
    if block_b is None:
        block_b = max(1, min(B, 64, max(1, 1024 // L)))
        # v7x megacore: if everything would fit one step but B >= 2, split it into
        # two parallel steps so both TensorCores get work.
        if B > 1 and pl.cdiv(B, block_b) == 1:
            block_b = pl.cdiv(B, 2)
    Bt = block_b
    n_steps = pl.cdiv(B, Bt)
    if n_steps > 1 and n_steps % 2:
        n_steps += 1                       # even "parallel" step count for v7x megacore
    Bpad = n_steps * Bt
    if Bpad != B:
        x = jnp.pad(x, ((0, Bpad - B), (0, 0), (0, 0)))
        h_state = jnp.pad(h_state, ((0, Bpad - B), (0, 0), (0, 0)))

    pe = positional_encoding(D, max_len)
    # Per-tile constant (<= Bt*L*D*4 ~ 128 KiB): kept pre-tiled so the kernel needs no
    # in-kernel reshape; it does NOT grow with the total batch B.
    pe_x = jnp.tile(pe[:L], (Bt, 1))                       # (Bt*L, D)
    pe_q = pe[0:Q * 2:2]                                   # (Q, D), even positions

    # fold the 1/sqrt(Dh) softmax scale into the Q part of the in-projection
    scale = 1.0 / math.sqrt(Dh)
    wq_s = params["w_in"][:, :D] * scale
    bq_s = params["b_in"][:, :D] * scale
    wkv = params["w_in"][:, D:]                            # (D, 2D)
    bk = params["b_in"][:, D:2 * D]
    bv = params["b_in"][:, 2 * D:]

    # lane-dense packed projection stack (D, 4D) and packed small vectors (13+2Q, D)
    wstack = jnp.concatenate([params["wqp"], wq_s, params["wo"], params["wout"]], axis=1)
    vecs = jnp.concatenate([
        params["b1"], params["g1"], params["be1"],
        params["bqp"], params["g2"], params["be2"],
        bq_s, bk, bv,
        params["bo"], params["g3"], params["be3"], params["bout"],
        params["lq"], pe_q,
    ], axis=0)

    # flatten batch tiles so every block equals the trailing dims of its array
    x_t = x.reshape(n_steps, Bt * L, Din)
    h_t = h_state.reshape(n_steps, Bt, D)

    def full_spec(arr):
        nd = arr.ndim
        return pl.BlockSpec(arr.shape, lambda b, nd=nd: (0,) * nd)

    kernel = functools.partial(_adapter_kernel, H, Q)

    out = pl.pallas_call(
        kernel,
        out_shape=jax.ShapeDtypeStruct((n_steps, Bt, Q * D), jnp.float32),
        grid_spec=pltpu.PrefetchScalarGridSpec(
            num_scalar_prefetch=0,
            grid=(n_steps,),
            in_specs=[
                pl.BlockSpec((1, Bt * L, Din), lambda b: (b, 0, 0)),   # x
                pl.BlockSpec((1, Bt, D), lambda b: (b, 0, 0)),         # h_state
                full_spec(pe_x), full_spec(vecs),
                full_spec(params["w1"]), full_spec(wkv), full_spec(wstack),
            ],
            out_specs=pl.BlockSpec((1, Bt, Q * D), lambda b: (b, 0, 0)),
        ),
        compiler_params=pltpu.CompilerParams(
            dimension_semantics=("parallel",),
            vmem_limit_bytes=48 * 1024 * 1024),
    )(x_t, h_t, pe_x, vecs, params["w1"], wkv, wstack)

    return out.reshape(Bpad, Q, D)[:B]


# ----------------------------- pure-JAX reference -----------------------------


def reference_forward(x, h_state, params, *, num_heads, num_queries, max_len):
    B, S, Din = x.shape
    D = params["w1"].shape[1]
    H, Dh, Q = num_heads, D // num_heads, num_queries
    if S < max_len:
        x = jnp.pad(x, ((0, 0), (0, max_len - S), (0, 0)))
    elif S > max_len:
        x = x[:, :max_len, :]
    pe = positional_encoding(D, max_len)

    with jax.default_matmul_precision("float32"):
        xp = x @ params["w1"] + params["b1"]
        xp = _layernorm(xp, params["g1"], params["be1"]) + pe[None, :max_len]

        q = params["lq"][None] + (h_state @ params["wqp"] + params["bqp"])
        q = _layernorm(q, params["g2"], params["be2"]) + pe[None, 0:Q * 2:2]

        Qp = q @ params["w_in"][:, :D] + params["b_in"][:, :D]
        Kp = xp @ params["w_in"][:, D:2 * D] + params["b_in"][:, D:2 * D]
        Vp = xp @ params["w_in"][:, 2 * D:] + params["b_in"][:, 2 * D:]
        rshp = lambda t: t.reshape(B, -1, H, Dh).transpose(0, 2, 1, 3)
        Qh, Kh, Vh = rshp(Qp), rshp(Kp), rshp(Vp)
        scores = jnp.einsum("bhqd,bhkd->bhqk", Qh, Kh) / math.sqrt(Dh)
        p = jax.nn.softmax(scores, axis=-1)
        o = jnp.einsum("bhqk,bhkd->bhqd", p, Vh).transpose(0, 2, 1, 3).reshape(B, Q, D)
        attn = o @ params["wo"] + params["bo"]
        attn = _layernorm(attn, params["g3"], params["be3"])
        return attn @ params["wout"] + params["bout"]


# ----------------------------- main -------------------------------------------


if __name__ == "__main__":
    input_dim, output_dim = 8, 32
    num_heads, num_queries, max_len = 4, 4, 16
    batch, seq_len = 2, 8          # seq_len < max_len exercises the padding branch

    key = jax.random.PRNGKey(0)
    kx, kh, kp = jax.random.split(key, 3)
    x = jax.random.normal(kx, (batch, seq_len, input_dim), jnp.float32)
    h_state = jax.random.normal(kh, (batch, 1, output_dim), jnp.float32)
    params = init_params(kp, input_dim, output_dim, num_queries)

    out = protein_adapter_forward(x, h_state, params,
                                  num_heads=num_heads,
                                  num_queries=num_queries,
                                  max_len=max_len)
    out = jax.block_until_ready(out)

    ref = reference_forward(x, h_state, params,
                            num_heads=num_heads,
                            num_queries=num_queries,
                            max_len=max_len)
    assert out.shape == (batch, num_queries, output_dim)
    max_err = float(jnp.max(jnp.abs(out - ref)))
    assert jnp.allclose(out, ref, atol=2e-3, rtol=2e-3), max_err

    print("KERNEL_OK")
</pallas_src>

<mosaic_0001>
module attributes {stable_mosaic.version = 11 : i64} {
  func.func @_adapter_kernel(%arg0: i32, %arg1: memref<1x16x8xf32, #tpu.memory_space<vmem>>, %arg2: memref<1x1x32xf32, #tpu.memory_space<vmem>>, %arg3: memref<16x32xf32, #tpu.memory_space<vmem>>, %arg4: memref<21x32xf32, #tpu.memory_space<vmem>>, %arg5: memref<8x32xf32, #tpu.memory_space<vmem>>, %arg6: memref<32x64xf32, #tpu.memory_space<vmem>>, %arg7: memref<32x128xf32, #tpu.memory_space<vmem>>, %arg8: memref<1x1x128xf32, #tpu.memory_space<vmem>>) attributes {dimension_semantics = [#tpu.dimension_semantics<parallel>], iteration_bounds = array<i64: 2>, scalar_prefetch = 0 : i64, scratch_operands = 0 : i64, tpu.core_type = #tpu.core_type<tc>, window_params = [{transform_indices = @transform_0, window_bounds = array<i64: 1, 16, 8>}, {transform_indices = @transform_1, window_bounds = array<i64: 1, 1, 32>}, {pipeline_mode = #tpu.pipeline_mode<synchronous>, transform_indices = @transform_2, window_bounds = array<i64: 16, 32>}, {pipeline_mode = #tpu.pipeline_mode<synchronous>, transform_indices = @transform_3, window_bounds = array<i64: 21, 32>}, {pipeline_mode = #tpu.pipeline_mode<synchronous>, transform_indices = @transform_4, window_bounds = array<i64: 8, 32>}, {pipeline_mode = #tpu.pipeline_mode<synchronous>, transform_indices = @transform_5, window_bounds = array<i64: 32, 64>}, {pipeline_mode = #tpu.pipeline_mode<synchronous>, transform_indices = @transform_6, window_bounds = array<i64: 32, 128>}, {transform_indices = @transform_7, window_bounds = array<i64: 1, 1, 128>}]} {
    %c0 = arith.constant 0 : index
    %c0_0 = arith.constant 0 : index
    %0 = vector.load %arg4[%c0, %c0_0] : memref<21x32xf32, #tpu.memory_space<vmem>>, vector<21x32xf32>
    %1 = vector.extract_strided_slice %0 {offsets = [0, 0], sizes = [1, 32], strides = [1, 1]} : vector<21x32xf32> to vector<1x32xf32>
    %2 = vector.extract_strided_slice %0 {offsets = [1, 0], sizes = [1, 32], strides = [1, 1]} : vector<21x32xf32> to vector<1x32xf32>
    %3 = vector.extract_strided_slice %0 {offsets = [2, 0], sizes = [1, 32], strides = [1, 1]} : vector<21x32xf32> to vector<1x32xf32>
    %4 = vector.extract_strided_slice %0 {offsets = [3, 0], sizes = [1, 32], strides = [1, 1]} : vector<21x32xf32> to vector<1x32xf32>
    %5 = vector.extract_strided_slice %0 {offsets = [4, 0], sizes = [1, 32], strides = [1, 1]} : vector<21x32xf32> to vector<1x32xf32>
    %6 = vector.extract_strided_slice %0 {offsets = [5, 0], sizes = [1, 32], strides = [1, 1]} : vector<21x32xf32> to vector<1x32xf32>
    %7 = vector.extract_strided_slice %0 {offsets = [6, 0], sizes = [1, 32], strides = [1, 1]} : vector<21x32xf32> to vector<1x32xf32>
    %8 = vector.extract_strided_slice %0 {offsets = [7, 0], sizes = [1, 32], strides = [1, 1]} : vector<21x32xf32> to vector<1x32xf32>
    %9 = vector.extract_strided_slice %0 {offsets = [8, 0], sizes = [1, 32], strides = [1, 1]} : vector<21x32xf32> to vector<1x32xf32>
    %10 = vector.extract_strided_slice %0 {offsets = [9, 0], sizes = [1, 32], strides = [1, 1]} : vector<21x32xf32> to vector<1x32xf32>
    %11 = vector.extract_strided_slice %0 {offsets = [10, 0], sizes = [1, 32], strides = [1, 1]} : vector<21x32xf32> to vector<1x32xf32>
    %12 = vector.extract_strided_slice %0 {offsets = [11, 0], sizes = [1, 32], strides = [1, 1]} : vector<21x32xf32> to vector<1x32xf32>
    %13 = vector.extract_strided_slice %0 {offsets = [12, 0], sizes = [1, 32], strides = [1, 1]} : vector<21x32xf32> to vector<1x32xf32>
    %14 = vector.extract_strided_slice %0 {offsets = [13, 0], sizes = [4, 32], strides = [1, 1]} : vector<21x32xf32> to vector<4x32xf32>
    %15 = vector.extract_strided_slice %0 {offsets = [17, 0], sizes = [4, 32], strides = [1, 1]} : vector<21x32xf32> to vector<4x32xf32>
    %c0_1 = arith.constant 0 : index
    %c0_2 = arith.constant 0 : index
    %16 = vector.load %arg7[%c0_1, %c0_2] : memref<32x128xf32, #tpu.memory_space<vmem>>, vector<32x128xf32>
    %17 = vector.extract_strided_slice %16 {offsets = [0, 0], sizes = [32, 32], strides = [1, 1]} : vector<32x128xf32> to vector<32x32xf32>
    %18 = vector.extract_strided_slice %16 {offsets = [0, 32], sizes = [32, 32], strides = [1, 1]} : vector<32x128xf32> to vector<32x32xf32>
    %19 = vector.extract_strided_slice %16 {offsets = [0, 64], sizes = [32, 32], strides = [1, 1]} : vector<32x128xf32> to vector<32x32xf32>
    %20 = vector.extract_strided_slice %16 {offsets = [0, 96], sizes = [32, 32], strides = [1, 1]} : vector<32x128xf32> to vector<32x32xf32>
    %c0_3 = arith.constant 0 : index
    %c0_4 = arith.constant 0 : index
    %c0_5 = arith.constant 0 : index
    %21 = vector.load %arg1[%c0_3, %c0_4, %c0_5] : memref<1x16x8xf32, #tpu.memory_space<vmem>>, vector<1x16x8xf32>
    %22 = vector.shape_cast %21 : vector<1x16x8xf32> to vector<16x8xf32>
    %c0_6 = arith.constant 0 : index
    %c0_7 = arith.constant 0 : index
    %23 = vector.load %arg5[%c0_6, %c0_7] : memref<8x32xf32, #tpu.memory_space<vmem>>, vector<8x32xf32>
    %cst = arith.constant dense<0.000000e+00> : vector<16x32xf32>
    %24 = tpu.matmul %22, %23, %cst {dimension_numbers = #tpu.dot_dimension_numbers<[1], [0], [0], [1], [0, 0, 1, 1], [], []>, precision = #tpu.contract_precision<fp32>} : vector<16x8xf32>, vector<8x32xf32>, vector<16x32xf32> -> vector<16x32xf32>
    %25 = vector.broadcast %1 : vector<1x32xf32> to vector<16x32xf32>
    %26 = arith.addf %24, %25 : vector<16x32xf32>
    %cst_8 = arith.constant dense<0.000000e+00> : vector<16xf32>
    %27 = vector.multi_reduction <add>, %26, %cst_8 [1] : vector<16x32xf32> to vector<16xf32>
    %28 = vector.shape_cast %27 : vector<16xf32> to vector<16x1xf32>
    %cst_9 = arith.constant 3.200000e+01 : f32
    %29 = vector.broadcast %cst_9 : f32 to vector<16x1xf32>
    %30 = arith.divf %28, %29 : vector<16x1xf32>
    %31 = vector.broadcast %30 : vector<16x1xf32> to vector<16x32xf32>
    %32 = arith.subf %26, %31 : vector<16x32xf32>
    %33 = arith.mulf %32, %32 : vector<16x32xf32>
    %cst_10 = arith.constant dense<0.000000e+00> : vector<16xf32>
    %34 = vector.multi_reduction <add>, %33, %cst_10 [1] : vector<16x32xf32> to vector<16xf32>
    %35 = vector.shape_cast %34 : vector<16xf32> to vector<16x1xf32>
    %cst_11 = arith.constant 3.200000e+01 : f32
    %36 = vector.broadcast %cst_11 : f32 to vector<16x1xf32>
    %37 = arith.divf %35, %36 : vector<16x1xf32>
    %38 = vector.broadcast %30 : vector<16x1xf32> to vector<16x32xf32>
    %39 = arith.subf %26, %38 : vector<16x32xf32>
    %cst_12 = arith.constant 9.99999974E-6 : f32
    %40 = vector.broadcast %cst_12 : f32 to vector<16x1xf32>
    %41 = arith.addf %37, %40 : vector<16x1xf32>
    %42 = math.sqrt %41 : vector<16x1xf32>
    %43 = vector.broadcast %42 : vector<16x1xf32> to vector<16x32xf32>
    %44 = arith.divf %39, %43 : vector<16x32xf32>
    %45 = vector.broadcast %2 : vector<1x32xf32> to vector<16x32xf32>
    %46 = arith.mulf %44, %45 : vector<16x32xf32>
    %47 = vector.broadcast %3 : vector<1x32xf32> to vector<16x32xf32>
    %48 = arith.addf %46, %47 : vector<16x32xf32>
    %c0_13 = arith.constant 0 : index
    %c0_14 = arith.constant 0 : index
    %49 = vector.load %arg3[%c0_13, %c0_14] : memref<16x32xf32, #tpu.memory_space<vmem>>, vector<16x32xf32>
    %50 = arith.addf %48, %49 : vector<16x32xf32>
    %c0_15 = arith.constant 0 : index
    %c0_16 = arith.constant 0 : index
    %51 = vector.load %arg6[%c0_15, %c0_16] : memref<32x64xf32, #tpu.memory_space<vmem>>, vector<32x64xf32>
    %cst_17 = arith.constant dense<0.000000e+00> : vector<16x64xf32>
    %52 = tpu.matmul %50, %51, %cst_17 {dimension_numbers = #tpu.dot_dimension_numbers<[1], [0], [0], [1], [0, 0, 1, 1], [], []>, precision = #tpu.contract_precision<fp32>} : vector<16x32xf32>, vector<32x64xf32>, vector<16x64xf32> -> vector<16x64xf32>
    %53 = tpu.concatenate %8, %9 in 1 : vector<1x32xf32>, vector<1x32xf32> -> vector<1x64xf32>
    %54 = vector.broadcast %53 : vector<1x64xf32> to vector<16x64xf32>
    %55 = arith.addf %52, %54 : vector<16x64xf32>
    %56 = vector.extract_strided_slice %55 {offsets = [0, 0], sizes = [16, 32], strides = [1, 1]} : vector<16x64xf32> to vector<16x32xf32>
    %57 = vector.extract_strided_slice %55 {offsets = [0, 32], sizes = [16, 32], strides = [1, 1]} : vector<16x64xf32> to vector<16x32xf32>
    %c0_18 = arith.constant 0 : index
    %c0_19 = arith.constant 0 : index
    %c0_20 = arith.constant 0 : index
    %58 = vector.load %arg2[%c0_18, %c0_19, %c0_20] : memref<1x1x32xf32, #tpu.memory_space<vmem>>, vector<1x1x32xf32>
    %59 = vector.shape_cast %58 : vector<1x1x32xf32> to vector<1x32xf32>
    %cst_21 = arith.constant dense<0.000000e+00> : vector<1x32xf32>
    %60 = tpu.matmul %59, %17, %cst_21 {dimension_numbers = #tpu.dot_dimension_numbers<[1], [0], [0], [1], [0, 0, 1, 1], [], []>, precision = #tpu.contract_precision<fp32>} : vector<1x32xf32>, vector<32x32xf32>, vector<1x32xf32> -> vector<1x32xf32>
    %61 = arith.addf %60, %4 : vector<1x32xf32>
    %62 = tpu.concatenate %61, %61, %61, %61 in 0 : vector<1x32xf32>, vector<1x32xf32>, vector<1x32xf32>, vector<1x32xf32> -> vector<4x32xf32>
    %63 = vector.extract_strided_slice %14 {offsets = [0, 0], sizes = [1, 32], strides = [1, 1]} : vector<4x32xf32> to vector<1x32xf32>
    %64 = vector.extract_strided_slice %14 {offsets = [1, 0], sizes = [1, 32], strides = [1, 1]} : vector<4x32xf32> to vector<1x32xf32>
    %65 = vector.extract_strided_slice %14 {offsets = [2, 0], sizes = [1, 32], strides = [1, 1]} : vector<4x32xf32> to vector<1x32xf32>
    %66 = vector.extract_strided_slice %14 {offsets = [3, 0], sizes = [1, 32], strides = [1, 1]} : vector<4x32xf32> to vector<1x32xf32>
    %67 = tpu.concatenate %63, %64, %65, %66 in 0 : vector<1x32xf32>, vector<1x32xf32>, vector<1x32xf32>, vector<1x32xf32> -> vector<4x32xf32>
    %68 = vector.extract_strided_slice %15 {offsets = [0, 0], sizes = [1, 32], strides = [1, 1]} : vector<4x32xf32> to vector<1x32xf32>
    %69 = vector.extract_strided_slice %15 {offsets = [1, 0], sizes = [1, 32], strides = [1, 1]} : vector<4x32xf32> to vector<1x32xf32>
    %70 = vector.extract_strided_slice %15 {offsets = [2, 0], sizes = [1, 32], strides = [1, 1]} : vector<4x32xf32> to vector<1x32xf32>
    %71 = vector.extract_strided_slice %15 {offsets = [3, 0], sizes = [1, 32], strides = [1, 1]} : vector<4x32xf32> to vector<1x32xf32>
    %72 = tpu.concatenate %68, %69, %70, %71 in 0 : vector<1x32xf32>, vector<1x32xf32>, vector<1x32xf32>, vector<1x32xf32> -> vector<4x32xf32>
    %73 = arith.addf %67, %62 : vector<4x32xf32>
    %cst_22 = arith.constant dense<0.000000e+00> : vector<4xf32>
    %74 = vector.multi_reduction <add>, %73, %cst_22 [1] : vector<4x32xf32> to vector<4xf32>
    %75 = vector.shape_cast %74 : vector<4xf32> to vector<4x1xf32>
    %cst_23 = arith.constant 3.200000e+01 : f32
    %76 = vector.broadcast %cst_23 : f32 to vector<4x1xf32>
    %77 = arith.divf %75, %76 : vector<4x1xf32>
    %78 = vector.broadcast %77 : vector<4x1xf32> to vector<4x32xf32>
    %79 = arith.subf %73, %78 : vector<4x32xf32>
    %80 = arith.mulf %79, %79 : vector<4x32xf32>
    %cst_24 = arith.constant dense<0.000000e+00> : vector<4xf32>
    %81 = vector.multi_reduction <add>, %80, %cst_24 [1] : vector<4x32xf32> to vector<4xf32>
    %82 = vector.shape_cast %81 : vector<4xf32> to vector<4x1xf32>
    %cst_25 = arith.constant 3.200000e+01 : f32
    %83 = vector.broadcast %cst_25 : f32 to vector<4x1xf32>
    %84 = arith.divf %82, %83 : vector<4x1xf32>
    %85 = vector.broadcast %77 : vector<4x1xf32> to vector<4x32xf32>
    %86 = arith.subf %73, %85 : vector<4x32xf32>
    %cst_26 = arith.constant 9.99999974E-6 : f32
    %87 = vector.broadcast %cst_26 : f32 to vector<4x1xf32>
    %88 = arith.addf %84, %87 : vector<4x1xf32>
    %89 = math.sqrt %88 : vector<4x1xf32>
    %90 = vector.broadcast %89 : vector<4x1xf32> to vector<4x32xf32>
    %91 = arith.divf %86, %90 : vector<4x32xf32>
    %92 = vector.broadcast %5 : vector<1x32xf32> to vector<4x32xf32>
    %93 = arith.mulf %91, %92 : vector<4x32xf32>
    %94 = vector.broadcast %6 : vector<1x32xf32> to vector<4x32xf32>
    %95 = arith.addf %93, %94 : vector<4x32xf32>
    %96 = arith.addf %95, %72 : vector<4x32xf32>
    %cst_27 = arith.constant dense<0.000000e+00> : vector<4x32xf32>
    %97 = tpu.matmul %96, %18, %cst_27 {dimension_numbers = #tpu.dot_dimension_numbers<[1], [0], [0], [1], [0, 0, 1, 1], [], []>, precision = #tpu.contract_precision<fp32>} : vector<4x32xf32>, vector<32x32xf32>, vector<4x32xf32> -> vector<4x32xf32>
    %98 = vector.broadcast %7 : vector<1x32xf32> to vector<4x32xf32>
    %99 = arith.addf %97, %98 : vector<4x32xf32>
    %100 = tpu.iota {dimensions = array<i32: 1>} : vector<4x32xi32>
    %c0_i32 = arith.constant 0 : i32
    %101 = vector.broadcast %c0_i32 : i32 to vector<4x32xi32>
    %102 = arith.cmpi sge, %100, %101 : vector<4x32xi32>
    %c8_i32 = arith.constant 8 : i32
    %103 = vector.broadcast %c8_i32 : i32 to vector<4x32xi32>
    %104 = arith.cmpi slt, %100, %103 : vector<4x32xi32>
    %105 = arith.andi %102, %104 : vector<4x32xi1>
    %106 = arith.extui %105 : vector<4x32xi1> to vector<4x32xi32>
    %107 = arith.sitofp %106 : vector<4x32xi32> to vector<4x32xf32>
    %108 = arith.mulf %99, %107 : vector<4x32xf32>
    %c8_i32_28 = arith.constant 8 : i32
    %109 = vector.broadcast %c8_i32_28 : i32 to vector<4x32xi32>
    %110 = arith.cmpi sge, %100, %109 : vector<4x32xi32>
    %c16_i32 = arith.constant 16 : i32
    %111 = vector.broadcast %c16_i32 : i32 to vector<4x32xi32>
    %112 = arith.cmpi slt, %100, %111 : vector<4x32xi32>
    %113 = arith.andi %110, %112 : vector<4x32xi1>
    %114 = arith.extui %113 : vector<4x32xi1> to vector<4x32xi32>
    %115 = arith.sitofp %114 : vector<4x32xi32> to vector<4x32xf32>
    %116 = arith.mulf %99, %115 : vector<4x32xf32>
    %c16_i32_29 = arith.constant 16 : i32
    %117 = vector.broadcast %c16_i32_29 : i32 to vector<4x32xi32>
    %118 = arith.cmpi sge, %100, %117 : vector<4x32xi32>
    %c24_i32 = arith.constant 24 : i32
    %119 = vector.broadcast %c24_i32 : i32 to vector<4x32xi32>
    %120 = arith.cmpi slt, %100, %119 : vector<4x32xi32>
    %121 = arith.andi %118, %120 : vector<4x32xi1>
    %122 = arith.extui %121 : vector<4x32xi1> to vector<4x32xi32>
    %123 = arith.sitofp %122 : vector<4x32xi32> to vector<4x32xf32>
    %124 = arith.mulf %99, %123 : vector<4x32xf32>
    %c24_i32_30 = arith.constant 24 : i32
    %125 = vector.broadcast %c24_i32_30 : i32 to vector<4x32xi32>
    %126 = arith.cmpi sge, %100, %125 : vector<4x32xi32>
    %c32_i32 = arith.constant 32 : i32
    %127 = vector.broadcast %c32_i32 : i32 to vector<4x32xi32>
    %128 = arith.cmpi slt, %100, %127 : vector<4x32xi32>
    %129 = arith.andi %126, %128 : vector<4x32xi1>
    %130 = arith.extui %129 : vector<4x32xi1> to vector<4x32xi32>
    %131 = arith.sitofp %130 : vector<4x32xi32> to vector<4x32xf32>
    %132 = arith.mulf %99, %131 : vector<4x32xf32>
    %133 = tpu.concatenate %108, %116, %124, %132 in 0 : vector<4x32xf32>, vector<4x32xf32>, vector<4x32xf32>, vector<4x32xf32> -> vector<16x32xf32>
    %cst_31 = arith.constant dense<0.000000e+00> : vector<16x16xf32>
    %134 = tpu.matmul %133, %56, %cst_31 {dimension_numbers = #tpu.dot_dimension_numbers<[1], [1], [0], [0], [0, 0, 1, 0], [], []>, precision = #tpu.contract_precision<fp32>} : vector<16x32xf32>, vector<16x32xf32>, vector<16x16xf32> -> vector<16x16xf32>
    %cst_32 = arith.constant dense<0xFF800000> : vector<16xf32>
    %135 = vector.multi_reduction <maximumf>, %134, %cst_32 [1] : vector<16x16xf32> to vector<16xf32>
    %136 = vector.shape_cast %135 : vector<16xf32> to vector<16x1xf32>
    %137 = vector.broadcast %136 : vector<16x1xf32> to vector<16x16xf32>
    %138 = arith.subf %134, %137 : vector<16x16xf32>
    %139 = math.exp %138 : vector<16x16xf32>
    %cst_33 = arith.constant dense<0.000000e+00> : vector<16xf32>
    %140 = vector.multi_reduction <add>, %139, %cst_33 [1] : vector<16x16xf32> to vector<16xf32>
    %141 = vector.shape_cast %140 : vector<16xf32> to vector<16x1xf32>
    %142 = vector.broadcast %141 : vector<16x1xf32> to vector<16x16xf32>
    %143 = arith.divf %139, %142 : vector<16x16xf32>
    %cst_34 = arith.constant dense<0.000000e+00> : vector<16x32xf32>
    %144 = tpu.matmul %143, %57, %cst_34 {dimension_numbers = #tpu.dot_dimension_numbers<[1], [0], [0], [1], [0, 0, 1, 1], [], []>, precision = #tpu.contract_precision<fp32>} : vector<16x16xf32>, vector<16x32xf32>, vector<16x32xf32> -> vector<16x32xf32>
    %145 = vector.extract_strided_slice %144 {offsets = [0, 0], sizes = [4, 32], strides = [1, 1]} : vector<16x32xf32> to vector<4x32xf32>
    %146 = arith.mulf %145, %107 : vector<4x32xf32>
    %147 = vector.extract_strided_slice %144 {offsets = [4, 0], sizes = [4, 32], strides = [1, 1]} : vector<16x32xf32> to vector<4x32xf32>
    %148 = arith.mulf %147, %115 : vector<4x32xf32>
    %149 = arith.addf %146, %148 : vector<4x32xf32>
    %150 = vector.extract_strided_slice %144 {offsets = [8, 0], sizes = [4, 32], strides = [1, 1]} : vector<16x32xf32> to vector<4x32xf32>
    %151 = arith.mulf %150, %123 : vector<4x32xf32>
    %152 = arith.addf %149, %151 : vector<4x32xf32>
    %153 = vector.extract_strided_slice %144 {offsets = [12, 0], sizes = [4, 32], strides = [1, 1]} : vector<16x32xf32> to vector<4x32xf32>
    %154 = arith.mulf %153, %131 : vector<4x32xf32>
    %155 = arith.addf %152, %154 : vector<4x32xf32>
    %cst_35 = arith.constant dense<0.000000e+00> : vector<4x32xf32>
    %156 = tpu.matmul %155, %19, %cst_35 {dimension_numbers = #tpu.dot_dimension_numbers<[1], [0], [0], [1], [0, 0, 1, 1], [], []>, precision = #tpu.contract_precision<fp32>} : vector<4x32xf32>, vector<32x32xf32>, vector<4x32xf32> -> vector<4x32xf32>
    %157 = vector.broadcast %10 : vector<1x32xf32> to vector<4x32xf32>
    %158 = arith.addf %156, %157 : vector<4x32xf32>
    %cst_36 = arith.constant dense<0.000000e+00> : vector<4xf32>
    %159 = vector.multi_reduction <add>, %158, %cst_36 [1] : vector<4x32xf32> to vector<4xf32>
    %160 = vector.shape_cast %159 : vector<4xf32> to vector<4x1xf32>
    %cst_37 = arith.constant 3.200000e+01 : f32
    %161 = vector.broadcast %cst_37 : f32 to vector<4x1xf32>
    %162 = arith.divf %160, %161 : vector<4x1xf32>
    %163 = vector.broadcast %162 : vector<4x1xf32> to vector<4x32xf32>
    %164 = arith.subf %158, %163 : vector<4x32xf32>
    %165 = arith.mulf %164, %164 : vector<4x32xf32>
    %cst_38 = arith.constant dense<0.000000e+00> : vector<4xf32>
    %166 = vector.multi_reduction <add>, %165, %cst_38 [1] : vector<4x32xf32> to vector<4xf32>
    %167 = vector.shape_cast %166 : vector<4xf32> to vector<4x1xf32>
    %cst_39 = arith.constant 3.200000e+01 : f32
    %168 = vector.broadcast %cst_39 : f32 to vector<4x1xf32>
    %169 = arith.divf %167, %168 : vector<4x1xf32>
    %170 = vector.broadcast %162 : vector<4x1xf32> to vector<4x32xf32>
    %171 = arith.subf %158, %170 : vector<4x32xf32>
    %cst_40 = arith.constant 9.99999974E-6 : f32
    %172 = vector.broadcast %cst_40 : f32 to vector<4x1xf32>
    %173 = arith.addf %169, %172 : vector<4x1xf32>
    %174 = math.sqrt %173 : vector<4x1xf32>
    %175 = vector.broadcast %174 : vector<4x1xf32> to vector<4x32xf32>
    %176 = arith.divf %171, %175 : vector<4x32xf32>
    %177 = vector.broadcast %11 : vector<1x32xf32> to vector<4x32xf32>
    %178 = arith.mulf %176, %177 : vector<4x32xf32>
    %179 = vector.broadcast %12 : vector<1x32xf32> to vector<4x32xf32>
    %180 = arith.addf %178, %179 : vector<4x32xf32>
    %cst_41 = arith.constant dense<0.000000e+00> : vector<4x32xf32>
    %181 = tpu.matmul %180, %20, %cst_41 {dimension_numbers = #tpu.dot_dimension_numbers<[1], [0], [0], [1], [0, 0, 1, 1], [], []>, precision = #tpu.contract_precision<fp32>} : vector<4x32xf32>, vector<32x32xf32>, vector<4x32xf32> -> vector<4x32xf32>
    %182 = vector.broadcast %13 : vector<1x32xf32> to vector<4x32xf32>
    %183 = arith.addf %181, %182 : vector<4x32xf32>
    %184 = vector.extract_strided_slice %183 {offsets = [0, 0], sizes = [1, 32], strides = [1, 1]} : vector<4x32xf32> to vector<1x32xf32>
    %185 = vector.extract_strided_slice %183 {offsets = [1, 0], sizes = [1, 32], strides = [1, 1]} : vector<4x32xf32> to vector<1x32xf32>
    %186 = vector.extract_strided_slice %183 {offsets = [2, 0], sizes = [1, 32], strides = [1, 1]} : vector<4x32xf32> to vector<1x32xf32>
    %187 = vector.extract_strided_slice %183 {offsets = [3, 0], sizes = [1, 32], strides = [1, 1]} : vector<4x32xf32> to vector<1x32xf32>
    %188 = tpu.concatenate %184, %185, %186, %187 in 1 : vector<1x32xf32>, vector<1x32xf32>, vector<1x32xf32>, vector<1x32xf32> -> vector<1x128xf32>
    %c0_42 = arith.constant 0 : index
    %c0_43 = arith.constant 0 : index
    %c0_44 = arith.constant 0 : index
    %189 = vector.load %arg8[%c0_42, %c0_43, %c0_44] : memref<1x1x128xf32, #tpu.memory_space<vmem>>, vector<1x1x128xf32>
    %190 = vector.shape_cast %189 : vector<1x1x128xf32> to vector<1x128xf32>
    %191 = vector.shape_cast %188 : vector<1x128xf32> to vector<1x1x128xf32>
    tpu.vector_store %arg8[%c0_42, %c0_43, %c0_44], %191 {strides = array<i32>} : memref<1x1x128xf32, #tpu.memory_space<vmem>>, vector<1x1x128xf32>,
    return
  }
  func.func @transform_0(%arg0: i32) -> (i32, i32, i32) {
    %c0_i32 = arith.constant 0 : i32
    %c0_i32_0 = arith.constant 0 : i32
    %c0_i32_1 = arith.constant 0 : i32
    return %arg0, %c0_i32, %c0_i32_0 : i32, i32, i32
  }
  func.func @transform_1(%arg0: i32) -> (i32, i32, i32) {
    %c0_i32 = arith.constant 0 : i32
    %c0_i32_0 = arith.constant 0 : i32
    %c0_i32_1 = arith.constant 0 : i32
    return %arg0, %c0_i32, %c0_i32_0 : i32, i32, i32
  }
  func.func @transform_2(%arg0: i32) -> (i32, i32) {
    %c0_i32 = arith.constant 0 : i32
    %c0_i32_0 = arith.constant 0 : i32
    %c0_i32_1 = arith.constant 0 : i32
    return %c0_i32, %c0_i32_0 : i32, i32
  }
  func.func @transform_3(%arg0: i32) -> (i32, i32) {
    %c0_i32 = arith.constant 0 : i32
    %c0_i32_0 = arith.constant 0 : i32
    %c0_i32_1 = arith.constant 0 : i32
    return %c0_i32, %c0_i32_0 : i32, i32
  }
  func.func @transform_4(%arg0: i32) -> (i32, i32) {
    %c0_i32 = arith.constant 0 : i32
    %c0_i32_0 = arith.constant 0 : i32
    %c0_i32_1 = arith.constant 0 : i32
    return %c0_i32, %c0_i32_0 : i32, i32
  }
  func.func @transform_5(%arg0: i32) -> (i32, i32) {
    %c0_i32 = arith.constant 0 : i32
    %c0_i32_0 = arith.constant 0 : i32
    %c0_i32_1 = arith.constant 0 : i32
    return %c0_i32, %c0_i32_0 : i32, i32
  }
  func.func @transform_6(%arg0: i32) -> (i32, i32) {
    %c0_i32 = arith.constant 0 : i32
    %c0_i32_0 = arith.constant 0 : i32
    %c0_i32_1 = arith.constant 0 : i32
    return %c0_i32, %c0_i32_0 : i32, i32
  }
  func.func @transform_7(%arg0: i32) -> (i32, i32, i32) {
    %c0_i32 = arith.constant 0 : i32
    %c0_i32_0 = arith.constant 0 : i32
    %c0_i32_1 = arith.constant 0 : i32
    return %arg0, %c0_i32, %c0_i32_0 : i32, i32, i32
  }
}

</mosaic_0001>

<bundles_post_ra>
// kernel: tpu_custom_call.1
= control target key start
LH: loop header
LB: loop body
LE: loop exit
PB: predicated region body
PF: predicated region fallthrough
CT: control target
= control target key end

     0   :  { %12 = vsyncpa [#allocation3], 0  ;;  %s3096_s0 = inlined_call_operand.vmem [shape: f32[2,16,8], index: 0, kind: input, shape index: {}]   ;;  %s3097_s1 = inlined_call_operand.vmem [shape: f32[2,1,32], index: 1, kind: input, shape index: {}]   ;;  %s3098_s2 = inlined_call_operand.vmem [shape: f32[16,32], index: 2, kind: input, shape index: {}]   ;;  %s3099_s3 = inlined_call_operand.hbm [shape: f32[21,32], index: 3, kind: input, shape index: {}]   ;;  %s3100_s4 = inlined_call_operand.hbm [shape: f32[8,32], index: 4, kind: input, shape index: {}]   ;;  %s3101_s5 = inlined_call_operand.vmem [shape: f32[32,64], index: 5, kind: input, shape index: {}]   ;;  %s3102_s6 = inlined_call_operand.hbm [shape: f32[32,128], index: 6, kind: input, shape index: {}]   ;;  %s3103_s7 = inlined_call_operand.hbm [shape: f32[2,1,128], index: 7, kind: output, shape index: {}]  }
   0x1   :  { %13 = vsyncpa [#allocation6], 0 }
   0x2   :  { %14 = vsyncpa [#allocation4], 0 }
   0x3   :  { %16 = vsyncpa [#allocation4 + $0x1], 0  ;;  %s2733_s24 = smov 0   ;;  %s2735_s25 = smov 0  }
   0x4   :  { %s2737_s26 = smov 0   ;;  %s2739_s27 = smov 0  }
   0x5 LB: > { %s2754_s28 = sadd.s32 4294967295, %s2681_s27   ;;  %s2398_s29 = sadd.s32 4294967294, %s2681_s27   ;;  %s2681_s27 = sphi %s2739_s27, %s3111_s27   ;;  %s2677_s26 = sphi %s2737_s26, %s3110_s26   ;;  %s2673_s25 = sphi %s2735_s25, %s3109_s25   ;;  %s2669_s24 = sphi %s2733_s24, %s3108_s24  }
   0x6   : > { %s2758_s30 = sadd.s32 1, %s2681_s27   ;;  %s186_s8 = sadd.s32 1, %s2677_s26 }
   0x7   : > { %s183_s9 = ssub.s32 %s2681_s27, %s2758_s30  ;;  %p196_p0 = scmp.ne.s32.totalorder %s2677_s26, %s2673_s25 }
   0x8   : > { %p184_p1 = scmp.eq.s32.totalorder %s183_s9, 0  ;;  %p197_p2 = scmp.eq.s32.totalorder %s2754_s28, 1 }
   0x9   : > { %p202_p3 = scmp.ne.s32.totalorder %s2673_s25, %s2669_s24  ;;  %p203_p4 = scmp.eq.s32.totalorder %s2398_s29, 1 }
   0xa   : > { %s2769_s10 = scalar_select %p184_p1, %s2677_s26, %s186_s8  }
   0xb   : > { %p2771_p5 = por %p197_p2, %p196_p0  ;;  %p2775_p6 = por %p203_p4, %p202_p3 }
   0xc   : > { %p2399_p7 = scmp.ge.s32.totalorder %s2681_s27, 1  ;;  %p210_p8 = scmp.lt.s32.totalorder %s2681_s27, 3 }
   0xd   : > { %p2445_p9 = scmp.eq.s32.totalorder %s2754_s28, 0  ;;  %s239_s16 = sshll.u32 %s3100_s4, 4  ;;  %s240_s16 = int_to_ptr.hbm [resolvable:$true] %s239_s16 }
   0xe   : > { %p2782_p10 = pnand %p2399_p7, %p210_p8  ;;  %s2683_s17 = smov [#allocation5]  }
   0xf   : > { %s241_s18 = sshll.u32 %s2683_s17, 4  ;;  %s224_s21 = sshll.u32 %s3099_s3, 4  ;;  %s242_s18 = int_to_ptr.vmem [resolvable:$true] %s241_s18  ;;  %s225_s21 = int_to_ptr.hbm [resolvable:$true] %s224_s21 }
  0x10   : > { %p2431_p11 = pneg %p2782_p10  ;;  %s2684_s23 = smov [#allocation2]  }
  0x11   : > { %s226_s29 = sshll.u32 %s2684_s23, 4  ;;  %s2685_s8 = smov 128   ;;  %s227_s29 = int_to_ptr.vmem [resolvable:$true] %s226_s29 }
  0x12   : > { %p2796_p12 = pnand %p2445_p9, %p2431_p11  ;;  %s2686_s9 = smov 8  }
  0x13   : > { %s253_s17 = sshll.u32 %s3102_s6, 4  ;;  %s2687_s19 = smov [#allocation7]   ;;  %s254_s17 = int_to_ptr.hbm [resolvable:$true] %s253_s17 }
  0x14   : > { %2437 = dma.hbm_to_vmem [thread:$0]  (!%p2796_p12), %s240_s16, 128, %s242_s18, [#allocation6]  }
  0x15   : > { %2434 = dma.hbm_to_vmem [thread:$0]  (!%p2796_p12), %s225_s21, 384, %s227_s29, [#allocation3], %s2685_s8, %s2685_s8, %s2686_s9  }
  0x16   : > { %s255_s20 = sshll.u32 %s2687_s19, 4  ;;  %285 = sbr.rel (%p2782_p10) target bundleno = 2443 (0x98b), region = 48  ;;  %s256_s20 = int_to_ptr.vmem [resolvable:$true] %s255_s20 }
  0x17   : > { %2440 = dma.hbm_to_vmem [thread:$0]  (!%p2796_p12), %s254_s17, 512, %s256_s20, [#allocation6], %s2685_s8, %s2685_s8, %s2686_s9  }
  0x1b   : > { %2656 = dma.done.wait (%p2445_p9), [#allocation3], 384  }
  0x1c   : > { %2658 = vsyncadd (%p2445_p9), [#allocation3], 4294966912 }
  0x1d   : > { %2660 = dma.done.wait (%p2445_p9), [#allocation6], 640  }
  0x1e   : > { %2662 = vsyncadd (%p2445_p9), [#allocation6], 4294966656  ;;  %p330_p13 = scmp.lt.s32.totalorder %s2754_s28, 1  ;;  %vm349_vm0 = vcmask 64512   ;;  %v347_v0 = vld [vmem:[#allocation5] sm:$0xff]  ;;  %v2827_v20 = vld [vmem:[#allocation2] sm:$0xff]  ;;  %s2299_s19 = scalar_lea.hbm %s3103_s7, %s2754_s28 }
  0x1f   : > { %v371_v3 = vand.u32 4294901760, %v347_v0  ;;  %v348_v21 = vperm.slane %v2827_v20, 0  ;;  %vm533_vm1 = vcmask 261120   ;;  %v2688_v48 = vmov 32.0   ;;  %s2689_s29 = smov 96   ;;  %s2690_s8 = smov 32  }
  0x20   : > { %s2821_s16 = scalar_select %p330_p13, %s2754_s28, 1  ;;  %2494 = vrcp.f32 %v2688_v48  ;;  %vm1059_vm15 = vcmask 1040384  }
  0x21   : > { %v406_v8 = vsub.f32 %v347_v0, %v371_v3  ;;  %372 = vmatpush.msra.mxu0 %v371_v3  ;;  %465 = vmatpush.msra.mxu3 %v371_v3  ;;  %s2692_s9 = smov 64   ;;  %s328_s14 = sand.u32 1, %s2673_s25  }
  0x22   : > { %s2416_s13 = sshll.u32 %s2821_s16, 4  ;;  %s329_s20 = scalar_lea.vmem [#allocation8], %s328_s14 }
  0x23   : > { %s334_s22 = scalar_lea.vmem %s3096_s0, %s2416_s13  ;;  %437 = vmatpush.msra.mxu2 %v406_v8  ;;  %v407_v11 = vand.u32 4294901760, %v406_v8  ;;  %s2301_s13 = sshll.u32 %s329_s20, 4  ;;  %s2302_s13 = int_to_ptr.vmem [resolvable:$true] %s2301_s13 }
  0x24   : > { %v345_v1 = vld [vmem:[%s334_s22] sm:$0xff]  ;;  %v346_v2 = vld [vmem:[%s334_s22 + $0x8] sm:$0xff]  ;;  %s337_s22 = scalar_lea.vmem %s3097_s1, %s2821_s16  ;;  %s2303_s18 = sshll.u32 %s2299_s19, 4  ;;  %s2304_s18 = int_to_ptr.hbm [resolvable:$true] %s2303_s18 }
  0x25   : > { %v351_v4 = vsel %vm349_vm0, %v345_v1, 0  ;;  %v354_v5 = vsel %vm349_vm0, %v346_v2, 0  ;;  %497 = vmatpush.msrb.mxu0 %v407_v11  ;;  %v408_v13 = vsub.f32 %v406_v8, %v407_v11  ;;  %v630_v2 = vld [vmem:[%s3101_s5 + $0x18] sm:$0xff]  ;;  %vm1063_vm0 = vcmask 1042432   ;;  %s2291_s21 = scalar_lea.sflag [#allocation4], %s328_s14 }
  0x26   : > { %v373_v6 = vand.u32 4294901760, %v351_v4  ;;  %v381_v7 = vand.u32 4294901760, %v354_v5  ;;  %v2495_v49 = vpop.eup %2494 }
  0x27   : > { %v409_v16 = vand.u32 4294901760, %v408_v13  ;;  %v541_v50 = vmul.f32 32.0, %v2495_v49  ;;  %vm545_vm2 = vweird.f32 %v2495_v49 }
  0x28   : > { %v374_v9 = vsub.f32 %v351_v4, %v373_v6  ;;  %v382_v10 = vsub.f32 %v354_v5, %v381_v7  ;;  %v628_v4 = vld [vmem:[%s3101_s5 + $0x8] sm:$0xff] }
  0x29   : > { %410 = vmatpush.msra.mxu1 %v409_v16  ;;  %v542_v51 = vsub.f32 1.0, %v541_v50  ;;  %v660_v8 = vand.u32 4294901760, %v628_v4 }
  0x2a   : > { %440 = vmatmul.f32.vlgmr.msra.gmra.mxu2 %v374_v9  ;;  %v375_v12 = vand.u32 4294901760, %v374_v9  ;;  %v383_v15 = vand.u32 4294901760, %v382_v10  ;;  %412 = vmatmul.f32.vlgmr.msra.gmra.mxu1 %v373_v6 }
  0x2b   : > { %523 = vmatpush.msrb.mxu1 %v371_v3  ;;  %v543_v52 = vmul.f32 %v2495_v49, %v542_v51  ;;  %v629_v3 = vld [vmem:[%s3101_s5 + $0x10] sm:$0xff] }
  0x2c   : > { %v376_v14 = vsub.f32 %v374_v9, %v375_v12  ;;  %469 = vmatmul.f32.vlgmr.msra.gmra.mxu3 %v375_v12  ;;  %v384_v18 = vsub.f32 %v382_v10, %v383_v15  ;;  %v627_v9 = vld [vmem:[%s3101_s5] sm:$0xff] }
  0x2d   : > { %v544_v53 = vadd.f32 %v2495_v49, %v543_v52 }
  0x2e   : > { %v377_v17 = vand.u32 4294901760, %v376_v14  ;;  %v385_v19 = vand.u32 4294901760, %v384_v18  ;;  %v706_v14 = vsub.f32 %v628_v4, %v660_v8 }
  0x2f   : > { %v2832_v54 = vsel %vm545_vm2, %v2495_v49, %v544_v53  ;;  %vm1061_vm2 = vcmask 1041408  }
  0x30   : > { %378 = vmatmul.f32.vlgmr.msra.gmra.mxu0 %v377_v17  ;;  %v707_v18 = vand.u32 4294901760, %v706_v14 }
  0x32   : > { %445 = vmatmul.f32.gmra.mxu2 %v382_v10  ;;  %416 = vmatmul.f32.gmra.mxu1 %v381_v7  ;;  %v2859_v10 = vand.u32 4294901760, %v627_v9 }
  0x34   : > { %475 = vmatmul.f32.gmra.mxu3 %v383_v15  ;;  %v712_v15 = vsub.f32 %v627_v9, %v2859_v10 }
  0x38   : > { %386 = vmatmul.f32.gmra.mxu0 %v385_v19  ;;  %v713_v19 = vand.u32 4294901760, %v712_v15 }
  0x3a   : > { %525 = vmatmul.f32.vlgmr.msrb.gmra.mxu1 %v373_v6 }
  0x40   : > { %499 = vmatmul.f32.vlgmr.msrb.gmra.mxu0 %v373_v6  ;;  %v656_v6 = vand.u32 4294901760, %v630_v2 }
  0x42   : > { %529 = vmatmul.f32.gmra.mxu1 %v381_v7  ;;  %657 = vmatpush.msrb.mxu2 %v656_v6  ;;  %v694_v12 = vsub.f32 %v630_v2, %v656_v6 }
  0x43   : > { %774 = vmatpush.msra.mxu1 %v656_v6 }
  0x44   : > { %740 = vmatpush.msra.mxu0 %v694_v12  ;;  %v695_v16 = vand.u32 4294901760, %v694_v12 }
  0x48   : > { %503 = vmatmul.f32.gmra.mxu0 %v381_v7  ;;  %v658_v7 = vand.u32 4294901760, %v629_v3 }
  0x4a   : > { %v700_v13 = vsub.f32 %v629_v3, %v658_v7  ;;  %659 = vmatpush.msrb.mxu2 %v658_v7  ;;  %776 = vmatpush.msra.mxu1 %v658_v7 }
  0x4c   : > { %v701_v17 = vand.u32 4294901760, %v700_v13  ;;  %743 = vmatpush.msra.mxu0 %v700_v13  ;;  %661 = vmatpush.msrb.mxu2 %v660_v8 }
  0x4d   : > { %778 = vmatpush.msra.mxu1 %v660_v8 }
  0x4e   : > { %746 = vmatpush.msra.mxu0 %v706_v14  ;;  %663 = vmatpush.msrb.mxu2 %v2859_v10 }
  0x4f   : > { %780 = vmatpush.msra.mxu1 %v2859_v10 }
  0x50   : > { %809 = vmatpush.msra.mxu2 %v695_v16  ;;  %749 = vmatpush.msra.mxu0 %v712_v15 }
  0x52   : > { %813 = vmatpush.msra.mxu2 %v701_v17 }
  0x54   : > { %817 = vmatpush.msra.mxu2 %v707_v18 }
  0x56   : > { %821 = vmatpush.msra.mxu2 %v713_v19 }
  0xa7   : > { %v413_v23 = vpop.f32.mrf.mxu1 }
  0xad   : > { %v379_v22 = vpop.f32.mrf.mxu0  ;;  %v441_v25 = vpop.f32.mrf.mxu2 }
  0xae   : > { %v380_v24 = vadd.f32 %v379_v22, %v348_v21  ;;  %v696_v22 = vsub.f32 %v694_v12, %v695_v16  ;;  %v2872_v12 = vld [vmem:[#allocation7 + $0x18] sm:$0xff] }
  0xaf   : > { %v417_v28 = vpop.f32.mrf.mxu1  ;;  %v470_v29 = vpop.f32.mrf.mxu3 }
  0xb0   : > { %v414_v26 = vadd.f32 %v413_v23, %v380_v24  ;;  %v702_v23 = vsub.f32 %v700_v13, %v701_v17  ;;  %v708_v24 = vsub.f32 %v706_v14, %v707_v18  ;;  %v2874_v13 = vld [vmem:[#allocation7 + $0x10] sm:$0xff] }
  0xb1   : > { %v2880_v16 = vand.u32 4294901760, %v2874_v13 }
  0xb2   : > { %v442_v30 = vadd.f32 %v441_v25, %v414_v26  ;;  %v697_v26 = vand.u32 4294901760, %v696_v22 }
  0xb4   : > { %v471_v32 = vadd.f32 %v470_v29, %v442_v30  ;;  %698 = vmatpush.msrb.mxu3 %v697_v26 }
  0xb5   : > { %v387_v27 = vpop.f32.mrf.mxu0  ;;  %v446_v34 = vpop.f32.mrf.mxu2 }
  0xb6   : > { %v388_v31 = vadd.f32 %v387_v27, %v348_v21  ;;  %v703_v27 = vand.u32 4294901760, %v702_v23  ;;  %v915_v23 = vsub.f32 %v2874_v13, %v2880_v16 }
  0xb7   : > { %v526_v36 = vpop.f32.mrf.mxu1  ;;  %v476_v40 = vpop.f32.mrf.mxu3 }
  0xb8   : > { %v418_v33 = vadd.f32 %v417_v28, %v388_v31  ;;  %v714_v28 = vsub.f32 %v712_v15, %v713_v19  ;;  %704 = vmatpush.msrb.mxu3 %v703_v27  ;;  %v2877_v15 = vand.u32 4294901760, %v2872_v12 }
  0xba   : > { %v447_v38 = vadd.f32 %v446_v34, %v418_v33  ;;  %v715_v34 = vand.u32 4294901760, %v714_v28  ;;  %880 = vmatpush.msrb.mxu0 %v2877_v15 }
  0xbc   : > { %v477_v42 = vadd.f32 %v476_v40, %v447_v38  ;;  %882 = vmatpush.msrb.mxu0 %v2880_v16 }
  0xbd   : > { %v500_v35 = vpop.f32.mrf.mxu0 }
  0xbe   : > { %v501_v37 = vadd.f32 %v500_v35, %v471_v32  ;;  %v709_v32 = vand.u32 4294901760, %v708_v24 }
  0xbf   : > { %v530_v44 = vpop.f32.mrf.mxu1 }
  0xc0   : > { %v527_v39 = vadd.f32 %v526_v36, %v501_v37  ;;  %710 = vmatpush.msrb.mxu3 %v709_v32 }
  0xc2   : > { %v534_v41 = vsel %vm533_vm1, %v527_v39, 0.0  ;;  %716 = vmatpush.msrb.mxu3 %v715_v34  ;;  %v916_v34 = vand.u32 4294901760, %v915_v23 }
  0xc3   : > { %535 = vadd.xlane.f32.xlu0 %v534_v41 }
  0xc4   : > { %844 = vmatpush.msra.mxu3 %v656_v6 }
  0xc5   : > { %v504_v43 = vpop.f32.mrf.mxu0 }
  0xc6   : > { %v505_v45 = vadd.f32 %v504_v43, %v477_v42  ;;  %846 = vmatpush.msra.mxu3 %v658_v7 }
  0xc8   : > { %v531_v46 = vadd.f32 %v530_v44, %v505_v45  ;;  %848 = vmatpush.msra.mxu3 %v660_v8 }
  0xca   : > { %v537_v47 = vsel %vm533_vm1, %v531_v46, 0.0  ;;  %850 = vmatpush.msra.mxu3 %v2859_v10 }
  0xcb   : > { %538 = vadd.xlane.f32.xlu0 %v537_v47 }
  0xdf   : > { %1132 = vrot.lane.b32.xlu0 %v2872_v12, %s2689_s29 }
 0x136   : > { %v536_v55 = vpop.xlane.xlu0 %535 }
 0x137   : > { %v547_v56 = vmul.f32 %v2832_v54, %v536_v55 }
 0x139   : > { %v2835_v57 = vsub.f32 %v527_v39, %v547_v56 }
 0x13b   : > { %v551_v58 = vmul.f32 %v2835_v57, %v2835_v57 }
 0x13d   : > { %v553_v59 = vsel %vm533_vm1, %v551_v58, 0.0 }
 0x13e   : > { %554 = vadd.xlane.f32.xlu1 %v553_v59  ;;  %v539_v60 = vpop.xlane.xlu0 %538 }
 0x13f   : > { %v548_v61 = vmul.f32 %v2832_v54, %v539_v60 }
 0x141   : > { %v2841_v62 = vsub.f32 %v531_v46, %v548_v61 }
 0x143   : > { %v552_v63 = vmul.f32 %v2841_v62, %v2841_v62 }
 0x145   : > { %v556_v0 = vsel %vm533_vm1, %v552_v63, 0.0 }
 0x146   : > { %557 = vadd.xlane.f32.xlu1 %v556_v0 }
 0x15f   : > { %1130 = vrot.lane.b32.xlu1 %v2874_v13, %s2689_s29 }
 0x1b1   : > { %v555_v1 = vpop.xlane.xlu1 %554 }
 0x1b2   : > { %v559_v5 = vmul.f32 %v555_v1, %v2832_v54  ;;  %v617_v1 = vperm.slane %v2827_v20, 1 }
 0x1b4   : > { %v561_v11 = vadd.f32 1e-05, %v559_v5  ;;  %v620_v5 = vperm.slane %v2827_v20, 2 }
 0x1b6   : > { %2496 = vrsqrt.f32 %v561_v11  ;;  %vm570_vm3 = vcmp.eq.f32.partialorder %v561_v11, inf  ;;  %v573_v42 = vand.u32 2147483648, %v561_v11  ;;  %vm572_vm4 = vcmp.eq.f32.partialorder %v561_v11, 0.0 }
 0x1b9   : > { %v558_v21 = vpop.xlane.xlu1 %557 }
 0x1ba   : > { %v560_v25 = vmul.f32 %v558_v21, %v2832_v54  ;;  %v909_v21 = vsub.f32 %v2872_v12, %v2877_v15 }
 0x1bc   : > { %v2497_v29 = vpop.eup %2496  ;;  %v562_v30 = vadd.f32 1e-05, %v560_v25  ;;  %v910_v26 = vand.u32 4294901760, %v909_v21 }
 0x1bd   : > { %v564_v31 = vmul.f32 %v2497_v29, %v561_v11 }
 0x1be   : > { %2498 = vrsqrt.f32 %v562_v30  ;;  %vm582_vm5 = vcmp.eq.f32.partialorder %v562_v30, inf  ;;  %v585_v49 = vand.u32 2147483648, %v562_v30  ;;  %vm584_vm6 = vcmp.eq.f32.partialorder %v562_v30, 0.0 }
 0x1bf   : > { %v565_v33 = vmul.f32 %v2497_v29, %v564_v31  ;;  %v860_v31 = vld [vmem:[%s337_s22] sm:$0x1]  ;;  %s2625_s22 = sshra.s32 %s2304_s18, 4  ;;  %s2626_s22 = int_to_ptr.hbm [resolvable:$true] %s2625_s22 }
 0x1c0   : > { %s2627_s23 = scalar_lea.hbm %s2626_s22, 1  ;;  %p2632_p3 = scmp.lt.s32.totalorder %s2626_s22, %s3103_s7 }
 0x1c1   : > { %v566_v35 = vmul.f32 0.5, %v565_v33  ;;  %v624_v33 = vld [vmem:[%s3098_s2 + $0x8] sm:$0xff]  ;;  %p2628_p0 = scmp.ne.s32.totalorder %s2626_s22, %s2627_s23 }
 0x1c3   : > { %v567_v36 = vsub.f32 1.5, %v566_v35  ;;  %v2904_v35 = vld [vmem:[#allocation7] sm:$0xff]  ;;  %p2629_p1 = pnand %p2628_p0, %p2771_p5 }
 0x1c4   : > { %v2499_v37 = vpop.eup %2498  ;;  %1126 = vrot.lane.b32.xlu0 %v2904_v35, %s2689_s29 }
 0x1c5   : > { %v568_v38 = vmul.f32 %v2497_v29, %v567_v36  ;;  %v576_v39 = vmul.f32 %v2499_v37, %v562_v30  ;;  %v911_v29 = vsub.f32 %v909_v21, %v910_v26  ;;  %v865_v36 = vsel %vm533_vm1, %v860_v31, 0  ;;  %v2944_v31 = vld [vmem:[#allocation2 + $0x10] sm:$0x1f]  ;;  %p2630_p2 = pneg %p2629_p1 }
 0x1c7   : > { %v569_v40 = vmul.f32 %v568_v38, %v561_v11  ;;  %v577_v41 = vmul.f32 %v2499_v37, %v576_v39  ;;  %v912_v38 = vand.u32 4294901760, %v911_v29  ;;  %v885_v39 = vand.u32 4294901760, %v2904_v35  ;;  %v2942_v29 = vld [vmem:[#allocation2 + $0x8] sm:$0xff] }
 0x1c9   : > { %v571_v43 = vsel %vm570_vm3, %v561_v11, %v569_v40  ;;  %v578_v44 = vmul.f32 0.5, %v577_v41  ;;  %v623_v11 = vld [vmem:[%s3098_s2] sm:$0xff]  ;;  %v887_v40 = vand.u32 4294901760, %v865_v36  ;;  %913 = vmatpush.msrb.mxu1 %v912_v38  ;;  %vm1077_vm3 = vcmask 257024  }
 0x1ca   : > { %v574_v45 = vsel %vm572_vm4, %v573_v42, %v571_v43  ;;  %v917_v42 = vsub.f32 %v915_v23, %v916_v34 }
 0x1cb   : > { %v579_v46 = vsub.f32 1.5, %v578_v44  ;;  %2500 = vrcp.f32 %v574_v45  ;;  %v598_v56 = vand.u32 2147483648, %v574_v45  ;;  %v596_v59 = vand.u32 2147483647, %v574_v45 }
 0x1cc   : > { %vm592_vm8 = vweird.f32 %v574_v45 }
 0x1cd   : > { %v580_v47 = vmul.f32 %v2499_v37, %v579_v46  ;;  %v599_v63 = vor.u32 1.1754944e-38, %v598_v56  ;;  %vm597_vm10 = vcmp.eq.f32.partialorder %v596_v59, 8.507059e+37  ;;  %v888_v46 = vsub.f32 %v865_v36, %v887_v40 }
 0x1cf   : > { %v581_v48 = vmul.f32 %v580_v47, %v562_v30  ;;  %v889_v56 = vand.u32 4294901760, %v888_v46 }
 0x1d1   : > { %v2501_v50 = vpop.eup %2500  ;;  %v583_v51 = vsel %vm582_vm5, %v562_v30, %v581_v48  ;;  %v2896_v30 = vld [vmem:[#allocation7 + $0x8] sm:$0xff]  ;;  %v918_v48 = vand.u32 4294901760, %v917_v42 }
 0x1d2   : > { %v588_v52 = vmul.f32 %v2501_v50, %v574_v45  ;;  %v586_v53 = vsel %vm584_vm6, %v585_v49, %v583_v51  ;;  %vm593_vm7 = vweird.f32 %v2501_v50  ;;  %v927_v45 = vsub.f32 %v2904_v35, %v885_v39 }
 0x1d3   : > { %2502 = vrcp.f32 %v586_v53  ;;  %vm594_vm9 = vmor %vm592_vm8, %vm593_vm7  ;;  %v613_v7 = vand.u32 2147483648, %v586_v53  ;;  %v611_v10 = vand.u32 2147483647, %v586_v53  ;;  %vm607_vm12 = vweird.f32 %v586_v53  ;;  %919 = vmatpush.msrb.mxu1 %v918_v48 }
 0x1d4   : > { %v589_v55 = vsub.f32 1.0, %v588_v52  ;;  %v928_v51 = vand.u32 4294901760, %v927_v45 }
 0x1d5   : > { %v614_v17 = vor.u32 1.1754944e-38, %v613_v7  ;;  %vm612_vm14 = vcmp.eq.f32.partialorder %v611_v10, 8.507059e+37 }
 0x1d6   : > { %v590_v58 = vmul.f32 %v2501_v50, %v589_v55 }
 0x1d8   : > { %v591_v60 = vadd.f32 %v2501_v50, %v590_v58  ;;  %v929_v58 = vsub.f32 %v927_v45, %v928_v51 }
 0x1d9   : > { %v2503_v61 = vpop.eup %2502 }
 0x1da   : > { %v595_v0 = vsel %vm594_vm9, %v2501_v50, %v591_v60  ;;  %v603_v2 = vmul.f32 %v2503_v61, %v586_v53  ;;  %vm608_vm11 = vweird.f32 %v2503_v61 }
 0x1db   : > { %v600_v3 = vsel %vm597_vm10, %v599_v63, %v595_v0  ;;  %vm609_vm13 = vmor %vm607_vm12, %vm608_vm11  ;;  %v890_v0 = vsub.f32 %v888_v46, %v889_v56 }
 0x1dc   : > { %v601_v4 = vmul.f32 %v600_v3, %v2835_v57  ;;  %v604_v6 = vsub.f32 1.0, %v603_v2 }
 0x1dd   : > { %v891_v3 = vand.u32 4294901760, %v890_v0 }
 0x1de   : > { %v618_v8 = vmul.f32 %v617_v1, %v601_v4  ;;  %v605_v9 = vmul.f32 %v2503_v61, %v604_v6 }
 0x1e0   : > { %v621_v14 = vadd.f32 %v620_v5, %v618_v8  ;;  %v606_v57 = vadd.f32 %v2503_v61, %v605_v9 }
 0x1e2   : > { %v625_v18 = vadd.f32 %v623_v11, %v621_v14  ;;  %v610_v19 = vsel %vm609_vm13, %v2503_v61, %v606_v57  ;;  %v930_v61 = vand.u32 4294901760, %v929_v58 }
 0x1e3   : > { %v615_v22 = vsel %vm612_vm14, %v614_v17, %v610_v19 }
 0x1e4   : > { %v639_v24 = vsel %vm533_vm1, %v625_v18, 0  ;;  %v616_v25 = vmul.f32 %v615_v22, %v2841_v62  ;;  %v883_v62 = vand.u32 4294901760, %v2896_v30 }
 0x1e5   : > { %v2894_v27 = vand.u32 4294901760, %v639_v24 }
 0x1e6   : > { %v619_v28 = vmul.f32 %v617_v1, %v616_v25  ;;  %v921_v43 = vsub.f32 %v2896_v30, %v883_v62  ;;  %884 = vmatpush.msrb.mxu0 %v883_v62 }
 0x1e7   : > { %718 = vmatmul.f32.vlgmr.msrb.gmra.mxu3 %v2894_v27  ;;  %v665_v32 = vsub.f32 %v639_v24, %v2894_v27 }
 0x1e8   : > { %v622_v37 = vadd.f32 %v620_v5, %v619_v28  ;;  %980 = vmatpush.msrb.mxu3 %v2877_v15  ;;  %v922_v49 = vand.u32 4294901760, %v921_v43  ;;  %886 = vmatpush.msrb.mxu0 %v885_v39 }
 0x1e9   : > { %752 = vmatmul.f32.vlgmr.msra.gmra.mxu0 %v665_v32  ;;  %v666_v41 = vand.u32 4294901760, %v665_v32 }
 0x1ea   : > { %v626_v44 = vadd.f32 %v624_v33, %v622_v37  ;;  %982 = vmatpush.msrb.mxu3 %v2880_v16  ;;  %v923_v55 = vsub.f32 %v921_v43, %v922_v49  ;;  %1009 = vmatpush.msra.mxu0 %v910_v26 }
 0x1eb   : > { %784 = vmatmul.f32.vlgmr.msra.gmra.mxu1 %v666_v41  ;;  %v667_v47 = vsub.f32 %v665_v32, %v666_v41 }
 0x1ec   : > { %v642_v50 = vsel %vm533_vm1, %v626_v44, 0  ;;  %984 = vmatpush.msrb.mxu3 %v883_v62  ;;  %v924_v60 = vand.u32 4294901760, %v923_v55  ;;  %1013 = vmatpush.msra.mxu0 %v916_v34  ;;  %v1065_v34 = vrot.slane %v2942_v29, 5 }
 0x1ed   : > { %v668_v52 = vand.u32 4294901760, %v667_v47  ;;  %v672_v53 = vand.u32 4294901760, %v642_v50 }
 0x1ee   : > { %986 = vmatpush.msrb.mxu3 %v885_v39  ;;  %925 = vmatpush.msrb.mxu1 %v924_v60 }
 0x1ef   : > { %669 = vmatmul.f32.vlgmr.msrb.gmra.mxu2 %v668_v52  ;;  %722 = vmatmul.f32.gmra.mxu3 %v672_v53  ;;  %v673_v59 = vsub.f32 %v642_v50, %v672_v53  ;;  %v632_v50 = vrot.slane %v2942_v29, 1 }
 0x1f0   : > { %951 = vmatpush.msrb.mxu2 %v909_v21  ;;  %1017 = vmatpush.msra.mxu0 %v922_v49 }
 0x1f1   : > { %757 = vmatmul.f32.gmra.mxu0 %v673_v59  ;;  %v674_v63 = vand.u32 4294901760, %v673_v59  ;;  %931 = vmatpush.msrb.mxu1 %v930_v61 }
 0x1f2   : > { %954 = vmatpush.msrb.mxu2 %v915_v23  ;;  %1021 = vmatpush.msra.mxu0 %v928_v51  ;;  %v1133_v51 = vpop.permute.xlu0 %1132 }
 0x1f3   : > { %790 = vmatmul.f32.gmra.mxu1 %v674_v63  ;;  %v675_v1 = vsub.f32 %v673_v59, %v674_v63  ;;  %v1153_v52 = vand.u32 4294901760, %v1133_v51 }
 0x1f4   : > { %957 = vmatpush.msrb.mxu2 %v921_v43  ;;  %1040 = vmatpush.msra.mxu1 %v2877_v15  ;;  %v862_v15 = vrot.slane %v2827_v20, 3 }
 0x1f5   : > { %v676_v2 = vand.u32 4294901760, %v675_v1  ;;  %v1183_v55 = vsub.f32 %v1133_v51, %v1153_v52 }
 0x1f6   : > { %960 = vmatpush.msrb.mxu2 %v927_v45  ;;  %1042 = vmatpush.msra.mxu1 %v2880_v16 }
 0x1f7   : > { %677 = vmatmul.f32.gmra.mxu2 %v676_v2  ;;  %852 = vmatmul.f32.vlgmr.msra.gmra.mxu3 %v2894_v27  ;;  %v1184_v58 = vand.u32 4294901760, %v1183_v55 }
 0x1f8   : > { %1044 = vmatpush.msra.mxu1 %v883_v62  ;;  %v1068_v62 = vrot.slane %v2944_v31, 5 }
 0x1f9   : > { %892 = vmatmul.f32.vlgmr.msrb.gmra.mxu0 %v891_v3  ;;  %v1185_v60 = vsub.f32 %v1183_v55, %v1184_v58 }
 0x1fa   : > { %1046 = vmatpush.msra.mxu1 %v885_v39  ;;  %1225 = vmatpush.msrb.mxu0 %v1183_v55 }
 0x1fb   : > { %933 = vmatmul.f32.vlgmr.msrb.gmra.mxu1 %v887_v40  ;;  %v1186_v1 = vand.u32 4294901760, %v1185_v60 }
 0x1fc   : > { %1254 = vmatpush.msrb.mxu1 %v1153_v52 }
 0x1fd   : > { %1187 = vmatpush.msra.mxu3 %v1186_v1 }
 0x1ff   : > { %823 = vmatmul.f32.vlgmr.msra.gmra.mxu2 %v2894_v27  ;;  %856 = vmatmul.f32.gmra.mxu3 %v672_v53 }
 0x200   : > { %1154 = vmatpush.msra.mxu2 %v1153_v52 }
 0x201   : > { %1023 = vmatmul.f32.vlgmr.msra.gmra.mxu0 %v887_v40 }
 0x203   : > { %1048 = vmatmul.f32.vlgmr.msra.gmra.mxu1 %v887_v40  ;;  %v1071_v40 = vsel %vm1063_vm0, %v1065_v34, %v1068_v62 }
 0x207   : > { %827 = vmatmul.f32.gmra.mxu2 %v672_v53  ;;  %990 = vmatmul.f32.vlgmr.msrb.gmra.mxu3 %v889_v56  ;;  %v1131_v53 = vpop.permute.xlu1 %1130 }
 0x208   : > { %v2965_v56 = vand.u32 4294901760, %v1131_v53 }
 0x20a   : > { %v1189_v59 = vsub.f32 %v1131_v53, %v2965_v56  ;;  %1256 = vmatpush.msrb.mxu1 %v2965_v56  ;;  %1156 = vmatpush.msra.mxu2 %v2965_v56 }
 0x20c   : > { %1228 = vmatpush.msrb.mxu0 %v1189_v59  ;;  %v1190_v3 = vand.u32 4294901760, %v1189_v59 }
 0x20f   : > { %963 = vmatmul.f32.vlgmr.msrb.gmra.mxu2 %v888_v46 }
 0x236   : > { %v1127_v63 = vpop.permute.xlu0 %1126 }
 0x266   : > { %v2921_v6 = vpop.f32.mrf.mxu0 }
 0x268   : > { %v2925_v8 = vpop.f32.mrf.mxu1 }
 0x26a   : > { %v2917_v4 = vpop.f32.mrf.mxu3 }
 0x26e   : > { %v2929_v10 = vpop.f32.mrf.mxu0 }
 0x270   : > { %v2935_v57 = vpop.f32.mrf.mxu1 }
 0x272   : > { %v2919_v5 = vpop.f32.mrf.mxu2  ;;  %v2923_v7 = vpop.f32.mrf.mxu3 }
 0x276   : > { %v893_v16 = vpop.f32.mrf.mxu0 }
 0x277   : > { %v894_v19 = vadd.f32 %v893_v16, %v862_v15  ;;  %v1159_v15 = vand.u32 4294901760, %v1127_v63 }
 0x278   : > { %v934_v21 = vpop.f32.mrf.mxu1 }
 0x279   : > { %v935_v22 = vadd.f32 %v934_v21, %v894_v19  ;;  %v1201_v16 = vsub.f32 %v1127_v63, %v1159_v15  ;;  %v1191_v19 = vsub.f32 %v1189_v59, %v1190_v3 }
 0x27a   : > { %v2927_v9 = vpop.f32.mrf.mxu2  ;;  %v2931_v11 = vpop.f32.mrf.mxu3 }
 0x27e   : > { %v1024_v26 = vpop.f32.mrf.mxu0 }
 0x280   : > { %v1049_v28 = vpop.f32.mrf.mxu1 }
 0x282   : > { %v2933_v14 = vpop.f32.mrf.mxu2  ;;  %v2938_v17 = vpop.f32.mrf.mxu3 }
 0x28a   : > { %v2940_v18 = vpop.f32.mrf.mxu2  ;;  %v991_v24 = vpop.f32.mrf.mxu3 }
 0x292   : > { %v964_v23 = vpop.f32.mrf.mxu2 }
 0x293   : > { %v965_v25 = vadd.f32 %v964_v23, %v935_v22  ;;  %v1202_v23 = vand.u32 4294901760, %v1201_v16 }
 0x295   : > { %v992_v27 = vadd.f32 %v991_v24, %v965_v25  ;;  %v1192_v24 = vand.u32 4294901760, %v1191_v19 }
 0x297   : > { %v1025_v32 = vadd.f32 %v1024_v26, %v992_v27  ;;  %1193 = vmatpush.msra.mxu3 %v1192_v24  ;;  %v1118_v24 = vperm.slane %v2827_v20, 5 }
 0x299   : > { %v1050_v33 = vadd.f32 %v1049_v28, %v1025_v32  ;;  %v1203_v32 = vsub.f32 %v1201_v16, %v1202_v23 }
 0x29b   : > { %v1053_v36 = vrot.slane %v1050_v33, 7  ;;  %v1055_v37 = vrot.slane %v1050_v33, 6  ;;  %v1057_v38 = vrot.slane %v1050_v33, 5 }
 0x29d   : > { %v1060_v39 = vsel %vm1059_vm15, %v1050_v33, %v1053_v36 }
 0x29e   : > { %v1062_v41 = vsel %vm1061_vm2, %v1060_v39, %v1055_v37  ;;  %v1204_v39 = vand.u32 4294901760, %v1203_v32 }
 0x29f   : > { %v1064_v42 = vsel %vm1063_vm0, %v1062_v41, %v1057_v38 }
 0x2a0   : > { %v1076_v43 = vadd.f32 %v1071_v40, %v1064_v42 }
 0x2a2   : > { %v1078_v44 = vsel %vm1077_vm3, %v1076_v43, 0.0 }
 0x2a3   : > { %1079 = vadd.xlane.f32.xlu2 %v1078_v44 }
 0x316   : > { %v1080_v45 = vpop.xlane.xlu2 %1079 }
 0x317   : > { %v1081_v46 = vmul.f32 %v1080_v45, %v2832_v54 }
 0x319   : > { %v2956_v47 = vsub.f32 %v1076_v43, %v1081_v46 }
 0x31b   : > { %v1083_v48 = vmul.f32 %v2956_v47, %v2956_v47 }
 0x31d   : > { %v1084_v49 = vsel %vm1077_vm3, %v1083_v48, 0.0 }
 0x31e   : > { %1085 = vadd.xlane.f32.xlu2 %v1084_v49 }
 0x336   : > { %1128 = vrot.lane.b32.xlu2 %v2896_v30, %s2689_s29 }
 0x33e   : > { %633 = vrot.lane.b32.xlu2 %v632_v50, %s2690_s8 }
 0x391   : > { %v1086_v61 = vpop.xlane.xlu2 %1085 }
 0x392   : > { %v1087_v0 = vmul.f32 %v1086_v61, %v2832_v54 }
 0x394   : > { %v1088_v2 = vadd.f32 1e-05, %v1087_v0 }
 0x396   : > { %2504 = vrsqrt.f32 %v1088_v2  ;;  %vm1096_vm4 = vcmp.eq.f32.partialorder %v1088_v2, inf  ;;  %v1099_v49 = vand.u32 2147483648, %v1088_v2  ;;  %vm1098_vm5 = vcmp.eq.f32.partialorder %v1088_v2, 0.0 }
 0x399   : > { %v1129_v21 = vpop.permute.xlu2 %1128 }
 0x39a   : > { %v1157_v22 = vand.u32 4294901760, %v1129_v21 }
 0x39c   : > { %v2505_v25 = vpop.eup %2504  ;;  %v1195_v26 = vsub.f32 %v1129_v21, %v1157_v22  ;;  %1258 = vmatpush.msrb.mxu1 %v1157_v22  ;;  %1158 = vmatpush.msra.mxu2 %v1157_v22 }
 0x39d   : > { %v1090_v27 = vmul.f32 %v2505_v25, %v1088_v2 }
 0x39e   : > { %v1196_v28 = vand.u32 4294901760, %v1195_v26  ;;  %1231 = vmatpush.msrb.mxu0 %v1195_v26  ;;  %1260 = vmatpush.msrb.mxu1 %v1159_v15 }
 0x39f   : > { %v1091_v33 = vmul.f32 %v2505_v25, %v1090_v27  ;;  %1160 = vmatpush.msra.mxu2 %v1159_v15 }
 0x3a0   : > { %1234 = vmatpush.msrb.mxu0 %v1201_v16  ;;  %v1197_v34 = vsub.f32 %v1195_v26, %v1196_v28 }
 0x3a1   : > { %1283 = vmatpush.msrb.mxu2 %v1184_v58  ;;  %v1092_v62 = vmul.f32 0.5, %v1091_v33  ;;  %v634_v36 = vpop.permute.xlu2 %633 }
 0x3a2   : > { %v636_v37 = vsel %vm533_vm1, %v2827_v20, %v634_v36  ;;  %v1198_v38 = vand.u32 4294901760, %v1197_v34 }
 0x3a3   : > { %1287 = vmatpush.msrb.mxu2 %v1190_v3  ;;  %v1093_v40 = vsub.f32 1.5, %v1092_v62  ;;  %v637_v41 = vperm.slane %v636_v37, 7 }
 0x3a4   : > { %1199 = vmatpush.msra.mxu3 %v1198_v38  ;;  %v1121_v38 = vperm.slane %v2827_v20, 6 }
 0x3a5   : > { %1291 = vmatpush.msrb.mxu2 %v1196_v28  ;;  %v1094_v42 = vmul.f32 %v2505_v25, %v1093_v40  ;;  %v671_v43 = vadd.f32 %v2919_v5, %v637_v41  ;;  %v679_v44 = vadd.f32 %v2927_v9, %v637_v41  ;;  %v1072_v25 = vrot.slane %v2944_v31, 1 }
 0x3a6   : > { %1205 = vmatpush.msra.mxu3 %v1204_v39  ;;  %v1326_v31 = vlaneseq }
 0x3a7   : > { %1295 = vmatpush.msrb.mxu2 %v1202_v23  ;;  %v1095_v45 = vmul.f32 %v1094_v42, %v1088_v2  ;;  %v720_v46 = vadd.f32 %v2917_v4, %v671_v43  ;;  %v724_v48 = vadd.f32 %v2923_v7, %v679_v44 }
 0x3a8   : > { %1314 = vmatpush.msrb.mxu3 %v1153_v52  ;;  %v1327_v39 = vand.u32 127, %v1326_v31 }
 0x3a9   : > { %v1097_v50 = vsel %vm1096_vm4, %v1088_v2, %v1095_v45  ;;  %v754_v51 = vadd.f32 %v2921_v6, %v720_v46  ;;  %v759_v53 = vadd.f32 %v2929_v10, %v724_v48 }
 0x3aa   : > { %1316 = vmatpush.msrb.mxu3 %v2965_v56  ;;  %v1100_v5 = vsel %vm1098_vm5, %v1099_v49, %v1097_v50  ;;  %vm1334_vm10 = vcmp.ge.s32.totalorder %v1327_v39, 8  ;;  %vm1335_vm11 = vcmp.lt.s32.totalorder %v1327_v39, 16  ;;  %vm1346_vm12 = vcmp.ge.s32.totalorder %v1327_v39, 24 }
 0x3ab   : > { %v786_v9 = vadd.f32 %v2925_v8, %v754_v51  ;;  %v792_v55 = vadd.f32 %v2935_v57, %v759_v53  ;;  %2506 = vrcp.f32 %v1100_v5  ;;  %v1110_v61 = vand.u32 2147483647, %v1100_v5  ;;  %vm1336_vm14 = vmand %vm1334_vm10, %vm1335_vm11 }
 0x3ac   : > { %1318 = vmatpush.msrb.mxu3 %v1157_v22  ;;  %vm1106_vm7 = vweird.f32 %v1100_v5  ;;  %vm1347_vm13 = vcmp.lt.s32.totalorder %v1327_v39, 32  ;;  %vm1340_vm15 = vcmp.ge.s32.totalorder %v1327_v39, 16  ;;  %vm1341_vm0 = vcmp.lt.s32.totalorder %v1327_v39, 24 }
 0x3ad   : > { %v825_v4 = vadd.f32 %v2933_v14, %v786_v9  ;;  %v829_v7 = vadd.f32 %v2940_v18, %v792_v55  ;;  %vm1111_vm9 = vcmp.eq.f32.partialorder %v1110_v61, 8.507059e+37  ;;  %vm1348_vm2 = vmand %vm1346_vm12, %vm1347_vm13  ;;  %vm1329_vm4 = vcmp.lt.s32.totalorder %v1327_v39, 8 }
 0x3ae   : > { %1320 = vmatpush.msrb.mxu3 %v1159_v15  ;;  %v1116_v15 = vperm.slane %v2827_v20, 4  ;;  %vm1342_vm5 = vmand %vm1340_vm15, %vm1341_vm0  ;;  %v2691_v51 = vmov 0.0  }
 0x3af   : > { %v2985_v52 = vadd.f32 %v2938_v17, %v829_v7  ;;  %v2988_v6 = vadd.f32 %v2931_v11, %v825_v4  ;;  %v1112_v17 = vand.u32 2147483648, %v1100_v5  ;;  %v3000_v53 = vsel %vm1336_vm14, 1.0, %v2691_v51 }
 0x3b0   : > { %v3004_v55 = vsel %vm1329_vm4, 1.0, %v2691_v51  ;;  %v3006_v4 = vsel %vm1342_vm5, 1.0, %v2691_v51 }
 0x3b1   : > { %v2507_v10 = vpop.eup %2506  ;;  %v1371_v56 = vsel %vm533_vm1, %v2985_v52, 0  ;;  %v1368_v8 = vsel %vm533_vm1, %v2988_v6, 0  ;;  %v1113_v3 = vor.u32 1.1754944e-38, %v1112_v17 }
 0x3b2   : > { %v1387_v57 = vand.u32 4294901760, %v1371_v56  ;;  %v1389_v58 = vand.u32 4294901760, %v1368_v8  ;;  %v1102_v59 = vmul.f32 %v2507_v10, %v1100_v5  ;;  %vm1107_vm6 = vweird.f32 %v2507_v10 }
 0x3b3   : > { %vm1108_vm8 = vmor %vm1106_vm7, %vm1107_vm6  ;;  %v3002_v5 = vsel %vm1348_vm2, 1.0, %v2691_v51  ;;  %vm1358_vm6 = vcmask 1043456   ;;  %vm1563_vm7 = vcmask 130048  }
 0x3b4   : > { %1388 = vmatpush.xpose.msra.mxu0 %v1387_v57  ;;  %v1423_v14 = vsub.f32 %v1371_v56, %v1387_v57  ;;  %v1429_v18 = vsub.f32 %v1368_v8, %v1389_v58  ;;  %v1103_v60 = vsub.f32 1.0, %v1102_v59 }
 0x3b6   : > { %v1424_v63 = vand.u32 4294901760, %v1423_v14  ;;  %v1430_v0 = vand.u32 4294901760, %v1429_v18  ;;  %v1104_v11 = vmul.f32 %v2507_v10, %v1103_v60 }
 0x3b8   : > { %1390 = vmatpush.xpose.msra.mxu0 %v1389_v58  ;;  %v1425_v1 = vsub.f32 %v1423_v14, %v1424_v63  ;;  %v1105_v2 = vadd.f32 %v2507_v10, %v1104_v11  ;;  %v1431_v19 = vsub.f32 %v1429_v18, %v1430_v0 }
 0x3ba   : > { %v1426_v16 = vand.u32 4294901760, %v1425_v1  ;;  %v1109_v21 = vsel %vm1108_vm8, %v2507_v10, %v1105_v2  ;;  %v1432_v26 = vand.u32 4294901760, %v1431_v19 }
 0x3bb   : > { %v1114_v22 = vsel %vm1111_vm9, %v1113_v3, %v1109_v21 }
 0x3bc   : > { %1427 = vmatpush.xpose.msra.mxu1 %v1426_v16  ;;  %v1115_v23 = vmul.f32 %v1114_v22, %v2956_v47 }
 0x3be   : > { %v1117_v27 = vmul.f32 %v1116_v15, %v1115_v23 }
 0x3c0   : > { %1433 = vmatpush.xpose.msra.mxu1 %v1432_v26  ;;  %v1119_v28 = vadd.f32 %v1118_v24, %v1117_v27 }
 0x3c2   : > { %v1120_v32 = vadd.f32 %v1119_v28, %v1072_v25 }
 0x3c4   : > { %v1139_v33 = vsel %vm533_vm1, %v1120_v32, 0 }
 0x3c5   : > { %v1161_v34 = vand.u32 4294901760, %v1139_v33 }
 0x3c7   : > { %1207 = vmatmul.f32.vlgmr.msra.gmra.mxu3 %v1161_v34  ;;  %v1162_v62 = vsub.f32 %v1139_v33, %v1161_v34 }
 0x3c8   : > { %1489 = vmatpush.xpose.msra.mxu3 %v1387_v57 }
 0x3c9   : > { %1237 = vmatmul.f32.vlgmr.msrb.gmra.mxu0 %v1162_v62  ;;  %v1163_v36 = vand.u32 4294901760, %v1162_v62 }
 0x3ca   : > { %1522 = vmatpush.xpose.msrb.mxu0 %v1424_v63 }
 0x3cb   : > { %1264 = vmatmul.f32.vlgmr.msrb.gmra.mxu1 %v1163_v36  ;;  %v1164_v47 = vsub.f32 %v1162_v62, %v1163_v36 }
 0x3cc   : > { %1491 = vmatpush.xpose.msra.mxu3 %v1389_v58  ;;  %1551 = vmatpush.xpose.msrb.mxu1 %v1387_v57 }
 0x3cd   : > { %v1165_v37 = vand.u32 4294901760, %v1164_v47 }
 0x3ce   : > { %1526 = vmatpush.xpose.msrb.mxu0 %v1430_v0 }
 0x3cf   : > { %1166 = vmatmul.f32.vlgmr.msra.gmra.mxu2 %v1165_v37  ;;  %1322 = vmatmul.f32.vlgmr.msrb.gmra.mxu3 %v1161_v34 }
 0x3d0   : > { %1459 = vmatpush.xpose.msra.mxu2 %v1423_v14  ;;  %1553 = vmatpush.xpose.msrb.mxu1 %v1389_v58 }
 0x3d4   : > { %1462 = vmatpush.xpose.msra.mxu2 %v1429_v18 }
 0x3d7   : > { %1297 = vmatmul.f32.vlgmr.msrb.gmra.mxu2 %v1161_v34 }
 0x446   : > { %v1238_v44 = vpop.f32.mrf.mxu0 }
 0x448   : > { %v1265_v46 = vpop.f32.mrf.mxu1 }
 0x44a   : > { %v1208_v40 = vpop.f32.mrf.mxu3 }
 0x452   : > { %v1167_v41 = vpop.f32.mrf.mxu2  ;;  %v1323_v20 = vpop.f32.mrf.mxu3 }
 0x453   : > { %v1168_v42 = vadd.f32 %v1167_v41, %v1121_v38 }
 0x455   : > { %v1209_v43 = vadd.f32 %v1208_v40, %v1168_v42 }
 0x457   : > { %v1239_v45 = vadd.f32 %v1238_v44, %v1209_v43 }
 0x459   : > { %v1266_v48 = vadd.f32 %v1265_v46, %v1239_v45 }
 0x45a   : > { %v1298_v49 = vpop.f32.mrf.mxu2 }
 0x45b   : > { %v1299_v50 = vadd.f32 %v1298_v49, %v1266_v48 }
 0x45d   : > { %v1324_v9 = vadd.f32 %v1323_v20, %v1299_v50 }
 0x45f   : > { %v1339_v7 = vmul.f32 %v3000_v53, %v1324_v9  ;;  %v1351_v10 = vmul.f32 %v3002_v5, %v1324_v9  ;;  %v1333_v56 = vmul.f32 %v3004_v55, %v1324_v9  ;;  %v1345_v8 = vmul.f32 %v3006_v4, %v1324_v9 }
 0x461   : > { %v1353_v57 = vrot.slane %v1339_v7, 4  ;;  %v1356_v58 = vrot.slane %v1351_v10, 4 }
 0x463   : > { %v1359_v59 = vsel %vm1358_vm6, %v1333_v56, %v1353_v57  ;;  %v1360_v14 = vsel %vm1358_vm6, %v1345_v8, %v1356_v58 }
 0x464   : > { %v1362_v18 = vsel %vm533_vm1, %v1359_v59, 0  ;;  %v1365_v60 = vsel %vm533_vm1, %v1360_v14, 0 }
 0x465   : > { %v1391_v61 = vand.u32 4294901760, %v1362_v18  ;;  %v1399_v17 = vand.u32 4294901760, %v1365_v60 }
 0x467   : > { %1435 = vmatmul.f32.vlgmr.msra.gmra.mxu1 %v1391_v61  ;;  %v1392_v63 = vsub.f32 %v1362_v18, %v1391_v61  ;;  %v1400_v11 = vsub.f32 %v1365_v60, %v1399_v17 }
 0x469   : > { %1465 = vmatmul.f32.vlgmr.msra.gmra.mxu2 %v1392_v63  ;;  %v1393_v0 = vand.u32 4294901760, %v1392_v63  ;;  %v1401_v3 = vand.u32 4294901760, %v1400_v11 }
 0x46b   : > { %1495 = vmatmul.f32.vlgmr.msra.gmra.mxu3 %v1393_v0  ;;  %v1394_v1 = vsub.f32 %v1392_v63, %v1393_v0  ;;  %v1402_v15 = vsub.f32 %v1400_v11, %v1401_v3 }
 0x46d   : > { %v1395_v2 = vand.u32 4294901760, %v1394_v1  ;;  %v1403_v16 = vand.u32 4294901760, %v1402_v15 }
 0x46f   : > { %1396 = vmatmul.f32.vlgmr.msra.gmra.mxu0 %v1395_v2  ;;  %1439 = vmatmul.f32.gmra.mxu1 %v1399_v17 }
 0x471   : > { %1470 = vmatmul.f32.gmra.mxu2 %v1400_v11 }
 0x473   : > { %1501 = vmatmul.f32.gmra.mxu3 %v1401_v3 }
 0x477   : > { %1404 = vmatmul.f32.gmra.mxu0 %v1403_v16  ;;  %1555 = vmatmul.f32.vlgmr.msrb.gmra.mxu1 %v1391_v61 }
 0x47f   : > { %1528 = vmatmul.f32.vlgmr.msrb.gmra.mxu0 %v1391_v61  ;;  %1559 = vmatmul.f32.gmra.mxu1 %v1399_v17 }
 0x487   : > { %1532 = vmatmul.f32.gmra.mxu0 %v1399_v17 }
 0x4e4   : > { %v1436_v19 = vpop.f32.mrf.mxu1 }
 0x4ec   : > { %v1397_v21 = vpop.f32.mrf.mxu0  ;;  %v1440_v22 = vpop.f32.mrf.mxu1 }
 0x4ed   : > { %v1437_v23 = vadd.f32 %v1436_v19, %v1397_v21  ;;  %v1466_v24 = vpop.f32.mrf.mxu2 }
 0x4ee   : > { %v1496_v27 = vpop.f32.mrf.mxu3 }
 0x4ef   : > { %v1467_v26 = vadd.f32 %v1466_v24, %v1437_v23 }
 0x4f1   : > { %v1497_v28 = vadd.f32 %v1496_v27, %v1467_v26 }
 0x4f4   : > { %v1405_v25 = vpop.f32.mrf.mxu0  ;;  %v1556_v33 = vpop.f32.mrf.mxu1 }
 0x4f5   : > { %v1441_v32 = vadd.f32 %v1440_v22, %v1405_v25  ;;  %v1471_v36 = vpop.f32.mrf.mxu2 }
 0x4f6   : > { %v1502_v38 = vpop.f32.mrf.mxu3 }
 0x4f7   : > { %v1472_v47 = vadd.f32 %v1471_v36, %v1441_v32 }
 0x4f9   : > { %v1503_v39 = vadd.f32 %v1502_v38, %v1472_v47 }
 0x4fc   : > { %v1529_v34 = vpop.f32.mrf.mxu0  ;;  %v1560_v42 = vpop.f32.mrf.mxu1 }
 0x4fd   : > { %v1530_v62 = vadd.f32 %v1529_v34, %v1497_v28 }
 0x4ff   : > { %v1557_v37 = vadd.f32 %v1556_v33, %v1530_v62 }
 0x501   : > { %v1564_v31 = vsel %vm1563_vm7, %v1557_v37, -inf }
 0x502   : > { %1565 = vmax.xlane.f32.xlu1 %v1564_v31 }
 0x504   : > { %v1533_v40 = vpop.f32.mrf.mxu0 }
 0x505   : > { %v1534_v41 = vadd.f32 %v1533_v40, %v1503_v39 }
 0x507   : > { %v1561_v43 = vadd.f32 %v1560_v42, %v1534_v41 }
 0x509   : > { %v1567_v44 = vsel %vm1563_vm7, %v1561_v43, -inf }
 0x50a   : > { %1568 = vmax.xlane.f32.xlu0 %v1567_v44 }
 0x51e   : > { %1614 = vrot.lane.b32.xlu0 %v2985_v52, %s2689_s29 }
 0x526   : > { %1832 = vrot.lane.b32.xlu0 %v2874_v13, %s2692_s9 }
 0x52e   : > { %1828 = vrot.lane.b32.xlu0 %v2904_v35, %s2692_s9 }
 0x536   : > { %2077 = vrot.lane.b32.xlu0 %v2872_v12, %s2690_s8 }
 0x53e   : > { %2075 = vrot.lane.b32.xlu0 %v2874_v13, %s2690_s8 }
 0x546   : > { %2073 = vrot.lane.b32.xlu0 %v2896_v30, %s2690_s8 }
 0x54e   : > { %2071 = vrot.lane.b32.xlu0 %v2904_v35, %s2690_s8 }
 0x575   : > { %v1566_v45 = vpop.xlane.xlu1 %1565 }
 0x576   : > { %v1570_v46 = vsub.f32 %v1557_v37, %v1566_v45 }
 0x578   : > { %v1572_v48 = vmul.f32 1.442695, %v1570_v46 }
 0x57a   : > { %2508 = vpow2.f32 %v1572_v48 }
 0x57d   : > { %v1569_v49 = vpop.xlane.xlu0 %1568 }
 0x57e   : > { %v1571_v50 = vsub.f32 %v1561_v43, %v1569_v49 }
 0x580   : > { %v2509_v20 = vpop.eup %2508  ;;  %v1574_v51 = vmul.f32 1.442695, %v1571_v50 }
 0x581   : > { %v1576_v9 = vsel %vm1563_vm7, %v2509_v20, 0.0 }
 0x582   : > { %2510 = vpow2.f32 %v1574_v51  ;;  %1577 = vadd.xlane.f32.xlu2 %v1576_v9 }
 0x588   : > { %v3019_v7 = vpop.eup %2510 }
 0x589   : > { %v1579_v10 = vsel %vm1563_vm7, %v3019_v7, 0.0 }
 0x58a   : > { %1580 = vadd.xlane.f32.xlu1 %v1579_v10 }
 0x590   : > { %v1615_v56 = vpop.permute.xlu0 %1614 }
 0x591   : > { %v1638_v52 = vand.u32 4294901760, %v1615_v56 }
 0x593   : > { %v1674_v8 = vsub.f32 %v1615_v56, %v1638_v52  ;;  %1639 = vmatpush.msrb.mxu2 %v1638_v52  ;;  %1740 = vmatpush.msra.mxu1 %v1638_v52 }
 0x595   : > { %v1675_v57 = vand.u32 4294901760, %v1674_v8  ;;  %1710 = vmatpush.msra.mxu0 %v1674_v8 }
 0x597   : > { %v1676_v58 = vsub.f32 %v1674_v8, %v1675_v57 }
 0x598   : > { %v1833_v45 = vpop.permute.xlu0 %1832 }
 0x599   : > { %v1677_v59 = vand.u32 4294901760, %v1676_v58  ;;  %v1857_v48 = vand.u32 4294901760, %v1833_v45 }
 0x59a   : > { %1612 = vrot.lane.b32.xlu2 %v2988_v6, %s2689_s29 }
 0x59b   : > { %1678 = vmatpush.msrb.mxu3 %v1677_v59 }
 0x5a0   : > { %v1829_v10 = vpop.permute.xlu0 %1828 }
 0x5a1   : > { %v1861_v8 = vand.u32 4294901760, %v1829_v10 }
 0x5a2   : > { %1830 = vrot.lane.b32.xlu2 %v2896_v30, %s2692_s9 }
 0x5a3   : > { %1834 = vrot.lane.b32.xlu1 %v2872_v12, %s2692_s9  ;;  %v1903_v58 = vsub.f32 %v1829_v10, %v1861_v8 }
 0x5f5   : > { %v1578_v6 = vpop.xlane.xlu2 %1577 }
 0x5f6   : > { %2512 = vrcp.f32 %v1578_v6  ;;  %v1593_v0 = vand.u32 2147483648, %v1578_v6  ;;  %v1591_v11 = vand.u32 2147483647, %v1578_v6  ;;  %vm1587_vm9 = vweird.f32 %v1578_v6 }
 0x5f8   : > { %v1594_v2 = vor.u32 1.1754944e-38, %v1593_v0  ;;  %vm1592_vm11 = vcmp.eq.f32.partialorder %v1591_v11, 8.507059e+37 }
 0x5fc   : > { %v2513_v14 = vpop.eup %2512 }
 0x5fd   : > { %v1583_v18 = vmul.f32 %v2513_v14, %v1578_v6  ;;  %v1613_v60 = vpop.permute.xlu2 %1612  ;;  %v1581_v61 = vpop.xlane.xlu1 %1580  ;;  %vm1588_vm8 = vweird.f32 %v2513_v14 }
 0x5fe   : > { %v1640_v17 = vand.u32 4294901760, %v1613_v60  ;;  %2514 = vrcp.f32 %v1581_v61  ;;  %vm1589_vm10 = vmor %vm1587_vm9, %vm1588_vm8  ;;  %v1608_v24 = vand.u32 2147483648, %v1581_v61  ;;  %v1606_v26 = vand.u32 2147483647, %v1581_v61 }
 0x5ff   : > { %v1584_v63 = vsub.f32 1.0, %v1583_v18  ;;  %vm1602_vm13 = vweird.f32 %v1581_v61  ;;  %vm2287_vm8 = vcmask 785408  }
 0x600   : > { %v1680_v12 = vsub.f32 %v1613_v60, %v1640_v17  ;;  %1641 = vmatpush.msrb.mxu2 %v1640_v17  ;;  %1742 = vmatpush.msra.mxu1 %v1640_v17  ;;  %v1609_v33 = vor.u32 1.1754944e-38, %v1608_v24  ;;  %vm1607_vm15 = vcmp.eq.f32.partialorder %v1606_v26, 8.507059e+37 }
 0x601   : > { %v1585_v13 = vmul.f32 %v2513_v14, %v1584_v63 }
 0x602   : > { %1773 = vmatpush.msra.mxu2 %v1675_v57  ;;  %1713 = vmatpush.msra.mxu0 %v1680_v12  ;;  %v1681_v30 = vand.u32 4294901760, %v1680_v12 }
 0x603   : > { %v1586_v35 = vadd.f32 %v2513_v14, %v1585_v13 }
 0x604   : > { %v2515_v1 = vpop.eup %2514  ;;  %1777 = vmatpush.msra.mxu2 %v1681_v30  ;;  %v1682_v3 = vsub.f32 %v1680_v12, %v1681_v30 }
 0x605   : > { %v1590_v15 = vsel %vm1589_vm10, %v2513_v14, %v1586_v35  ;;  %v1598_v16 = vmul.f32 %v2515_v1, %v1581_v61  ;;  %vm1603_vm12 = vweird.f32 %v2515_v1  ;;  %v1904_v14 = vand.u32 4294901760, %v1903_v58 }
 0x606   : > { %v1595_v19 = vsel %vm1592_vm11, %v1594_v2, %v1590_v15  ;;  %v1683_v21 = vand.u32 4294901760, %v1682_v3  ;;  %vm1604_vm14 = vmor %vm1602_vm13, %vm1603_vm12 }
 0x607   : > { %v1599_v22 = vsub.f32 1.0, %v1598_v16  ;;  %v1596_v23 = vmul.f32 %v2509_v20, %v1595_v19  ;;  %v1891_v20 = vsub.f32 %v1833_v45, %v1857_v48  ;;  %v1905_v63 = vsub.f32 %v1903_v58, %v1904_v14 }
 0x608   : > { %1684 = vmatpush.msrb.mxu3 %v1683_v21 }
 0x609   : > { %v1600_v25 = vmul.f32 %v2515_v1, %v1599_v22  ;;  %v1619_v27 = vsel %vm1563_vm7, %v1596_v23, 0  ;;  %v1892_v59 = vand.u32 4294901760, %v1891_v20  ;;  %v1906_v0 = vand.u32 4294901760, %v1905_v63 }
 0x60a   : > { %1802 = vmatpush.msra.mxu3 %v1638_v52  ;;  %v1642_v28 = vand.u32 4294901760, %v1619_v27 }
 0x60b   : > { %v1601_v32 = vadd.f32 %v2515_v1, %v1600_v25  ;;  %v1893_v18 = vsub.f32 %v1891_v20, %v1892_v59 }
 0x60c   : > { %1804 = vmatpush.msra.mxu3 %v1640_v17  ;;  %v1643_v34 = vsub.f32 %v1619_v27, %v1642_v28 }
 0x60d   : > { %1686 = vmatmul.f32.vlgmr.msrb.gmra.mxu3 %v1642_v28  ;;  %v1605_v62 = vsel %vm1604_vm14, %v2515_v1, %v1601_v32  ;;  %v1894_v60 = vand.u32 4294901760, %v1893_v18 }
 0x60e   : > { %v1610_v36 = vsel %vm1607_vm15, %v1609_v33, %v1605_v62  ;;  %1716 = vmatmul.f32.vlgmr.msra.gmra.mxu0 %v1643_v34  ;;  %v1644_v47 = vand.u32 4294901760, %v1643_v34 }
 0x60f   : > { %v1611_v37 = vmul.f32 %v3019_v7, %v1610_v36  ;;  %v1831_v7 = vpop.permute.xlu2 %1830 }
 0x610   : > { %1746 = vmatmul.f32.vlgmr.msra.gmra.mxu1 %v1644_v47  ;;  %v1645_v31 = vsub.f32 %v1643_v34, %v1644_v47  ;;  %v1859_v52 = vand.u32 4294901760, %v1831_v7 }
 0x611   : > { %v1622_v38 = vsel %vm1563_vm7, %v1611_v37, 0  ;;  %vm2285_vm7 = vcmask 523264  }
 0x612   : > { %v1646_v39 = vand.u32 4294901760, %v1645_v31  ;;  %v1650_v40 = vand.u32 4294901760, %v1622_v38  ;;  %v1897_v57 = vsub.f32 %v1831_v7, %v1859_v52 }
 0x614   : > { %1647 = vmatmul.f32.vlgmr.msrb.gmra.mxu2 %v1646_v39  ;;  %v1651_v41 = vsub.f32 %v1622_v38, %v1650_v40  ;;  %v1898_v6 = vand.u32 4294901760, %v1897_v57 }
 0x615   : > { %1690 = vmatmul.f32.gmra.mxu3 %v1650_v40  ;;  %v1835_v46 = vpop.permute.xlu1 %1834 }
 0x616   : > { %1721 = vmatmul.f32.gmra.mxu0 %v1651_v41  ;;  %v1652_v42 = vand.u32 4294901760, %v1651_v41  ;;  %v1855_v49 = vand.u32 4294901760, %v1835_v46  ;;  %v1899_v61 = vsub.f32 %v1897_v57, %v1898_v6 }
 0x618   : > { %1752 = vmatmul.f32.gmra.mxu1 %v1652_v42  ;;  %v1653_v43 = vsub.f32 %v1651_v41, %v1652_v42  ;;  %v1885_v50 = vsub.f32 %v1835_v46, %v1855_v49  ;;  %1856 = vmatpush.msrb.mxu0 %v1855_v49  ;;  %v1900_v17 = vand.u32 4294901760, %v1899_v61 }
 0x619   : > { %1956 = vmatpush.msrb.mxu3 %v1855_v49 }
 0x61a   : > { %v1654_v44 = vand.u32 4294901760, %v1653_v43  ;;  %v1886_v51 = vand.u32 4294901760, %v1885_v50  ;;  %1858 = vmatpush.msrb.mxu0 %v1857_v48  ;;  %1927 = vmatpush.msrb.mxu2 %v1885_v50 }
 0x61b   : > { %1958 = vmatpush.msrb.mxu3 %v1857_v48 }
 0x61c   : > { %1655 = vmatmul.f32.gmra.mxu2 %v1654_v44  ;;  %v1887_v9 = vsub.f32 %v1885_v50, %v1886_v51  ;;  %1860 = vmatpush.msrb.mxu0 %v1859_v52 }
 0x61d   : > { %1806 = vmatmul.f32.vlgmr.msra.gmra.mxu3 %v1642_v28  ;;  %1930 = vmatpush.msrb.mxu2 %v1891_v20 }
 0x61e   : > { %v1888_v56 = vand.u32 4294901760, %v1887_v9  ;;  %1960 = vmatpush.msrb.mxu3 %v1859_v52  ;;  %1862 = vmatpush.msrb.mxu0 %v1861_v8 }
 0x61f   : > { %1933 = vmatpush.msrb.mxu2 %v1897_v57  ;;  %v2078_v57 = vpop.permute.xlu0 %2077 }
 0x620   : > { %1889 = vmatpush.msrb.mxu1 %v1888_v56  ;;  %1985 = vmatpush.msra.mxu0 %v1886_v51 }
 0x621   : > { %1962 = vmatpush.msrb.mxu3 %v1861_v8  ;;  %1936 = vmatpush.msrb.mxu2 %v1903_v58  ;;  %v2098_v58 = vand.u32 4294901760, %v2078_v57 }
 0x622   : > { %1989 = vmatpush.msra.mxu0 %v1892_v59  ;;  %1895 = vmatpush.msrb.mxu1 %v1894_v60 }
 0x623   : > { %v2128_v59 = vsub.f32 %v2078_v57, %v2098_v58 }
 0x624   : > { %1779 = vmatmul.f32.vlgmr.msra.gmra.mxu2 %v1642_v28  ;;  %1993 = vmatpush.msra.mxu0 %v1898_v6 }
 0x625   : > { %1810 = vmatmul.f32.gmra.mxu3 %v1650_v40  ;;  %1901 = vmatpush.msrb.mxu1 %v1900_v17 }
 0x626   : > { %1997 = vmatpush.msra.mxu0 %v1904_v14  ;;  %2099 = vmatpush.msra.mxu2 %v2098_v58 }
 0x627   : > { %1907 = vmatpush.msrb.mxu1 %v1906_v0  ;;  %v2076_v0 = vpop.permute.xlu0 %2075 }
 0x629   : > { %2016 = vmatpush.msra.mxu1 %v1855_v49 }
 0x62b   : > { %2018 = vmatpush.msra.mxu1 %v1857_v48 }
 0x62c   : > { %1783 = vmatmul.f32.gmra.mxu2 %v1650_v40 }
 0x62d   : > { %2020 = vmatpush.msra.mxu1 %v1859_v52 }
 0x62f   : > { %2022 = vmatpush.msra.mxu1 %v1861_v8 }
 0x68b   : > { %v1717_v35 = vpop.f32.mrf.mxu0 }
 0x68d   : > { %v1747_v3 = vpop.f32.mrf.mxu1 }
 0x690   : > { %v1687_v12 = vpop.f32.mrf.mxu3 }
 0x693   : > { %v1722_v23 = vpop.f32.mrf.mxu0 }
 0x695   : > { %v1753_v27 = vpop.f32.mrf.mxu1 }
 0x697   : > { %v1648_v13 = vpop.f32.mrf.mxu2 }
 0x698   : > { %v1691_v11 = vpop.f32.mrf.mxu3  ;;  %v1688_v30 = vadd.f32 %v1687_v12, %v1648_v13  ;;  %v2074_v12 = vpop.permute.xlu0 %2073  ;;  %v2100_v13 = vand.u32 4294901760, %v2076_v0 }
 0x69a   : > { %v1718_v2 = vadd.f32 %v1717_v35, %v1688_v30  ;;  %v2102_v30 = vand.u32 4294901760, %v2074_v12  ;;  %2101 = vmatpush.msra.mxu2 %v2100_v13 }
 0x69c   : > { %v1748_v16 = vadd.f32 %v1747_v3, %v1718_v2  ;;  %v2140_v2 = vsub.f32 %v2074_v12, %v2102_v30  ;;  %2103 = vmatpush.msra.mxu2 %v2102_v30 }
 0x69f   : > { %v1656_v1 = vpop.f32.mrf.mxu2 }
 0x6a0   : > { %v1692_v15 = vadd.f32 %v1691_v11, %v1656_v1  ;;  %v1807_v19 = vpop.f32.mrf.mxu3  ;;  %v2134_v11 = vsub.f32 %v2076_v0, %v2100_v13  ;;  %v2072_v35 = vpop.permute.xlu0 %2071 }
 0x6a1   : > { %v2104_v3 = vand.u32 4294901760, %v2072_v35 }
 0x6a2   : > { %v1723_v24 = vadd.f32 %v1722_v23, %v1692_v15  ;;  %v2135_v1 = vand.u32 4294901760, %v2134_v11  ;;  %v2141_v15 = vand.u32 4294901760, %v2140_v2 }
 0x6a3   : > { %2105 = vmatpush.msra.mxu2 %v2104_v3 }
 0x6a4   : > { %v1754_v28 = vadd.f32 %v1753_v27, %v1723_v24  ;;  %v2142_v23 = vsub.f32 %v2140_v2, %v2141_v15 }
 0x6a6   : > { %v2143_v24 = vand.u32 4294901760, %v2142_v23 }
 0x6a7   : > { %v1780_v21 = vpop.f32.mrf.mxu2 }
 0x6a8   : > { %v1781_v22 = vadd.f32 %v1780_v21, %v1748_v16  ;;  %v1811_v62 = vpop.f32.mrf.mxu3  ;;  %v2146_v16 = vsub.f32 %v2072_v35, %v2104_v3 }
 0x6aa   : > { %v1808_v25 = vadd.f32 %v1807_v19, %v1781_v22  ;;  %v2136_v19 = vsub.f32 %v2134_v11, %v2135_v1  ;;  %v2147_v21 = vand.u32 4294901760, %v2146_v16 }
 0x6ac   : > { %v1815_v26 = vmul.f32 %v3000_v53, %v1808_v25  ;;  %v1814_v36 = vmul.f32 %v3004_v55, %v1808_v25  ;;  %v1827_v55 = vperm.slane %v2942_v29, 1  ;;  %v2129_v29 = vand.u32 4294901760, %v2128_v59 }
 0x6ad   : > { %v2137_v22 = vand.u32 4294901760, %v2136_v19  ;;  %v2148_v25 = vsub.f32 %v2146_v16, %v2147_v21 }
 0x6ae   : > { %v1817_v33 = vrot.slane %v1815_v26, 4  ;;  %v2130_v6 = vsub.f32 %v2128_v59, %v2129_v29 }
 0x6af   : > { %v1784_v32 = vpop.f32.mrf.mxu2  ;;  %v2149_v26 = vand.u32 4294901760, %v2148_v25 }
 0x6b0   : > { %v1785_v34 = vadd.f32 %v1784_v32, %v1754_v28  ;;  %v1819_v37 = vadd.f32 %v1817_v33, %v1814_v36  ;;  %v2131_v14 = vand.u32 4294901760, %v2130_v6 }
 0x6b2   : > { %v1812_v47 = vadd.f32 %v1811_v62, %v1785_v34  ;;  %2132 = vmatpush.msra.mxu3 %v2131_v14 }
 0x6b4   : > { %v1820_v31 = vmul.f32 %v3006_v4, %v1812_v47  ;;  %v1822_v38 = vmul.f32 %v3002_v5, %v1812_v47  ;;  %2138 = vmatpush.msra.mxu3 %v2137_v22 }
 0x6b6   : > { %v1821_v39 = vadd.f32 %v1820_v31, %v1819_v37  ;;  %v1824_v40 = vrot.slane %v1822_v38, 4  ;;  %2144 = vmatpush.msra.mxu3 %v2143_v24 }
 0x6b8   : > { %v1826_v41 = vadd.f32 %v1824_v40, %v1821_v39  ;;  %2150 = vmatpush.msra.mxu3 %v2149_v26 }
 0x6ba   : > { %v1841_v42 = vsel %vm533_vm1, %v1826_v41, 0 }
 0x6bb   : > { %v1863_v53 = vand.u32 4294901760, %v1841_v42 }
 0x6bd   : > { %1909 = vmatmul.f32.vlgmr.msrb.gmra.mxu1 %v1863_v53  ;;  %v1864_v43 = vsub.f32 %v1841_v42, %v1863_v53 }
 0x6be   : > { %2199 = vmatpush.msrb.mxu1 %v2098_v58 }
 0x6bf   : > { %1939 = vmatmul.f32.vlgmr.msrb.gmra.mxu2 %v1864_v43  ;;  %v1865_v44 = vand.u32 4294901760, %v1864_v43 }
 0x6c0   : > { %2201 = vmatpush.msrb.mxu1 %v2100_v13  ;;  %2228 = vmatpush.msrb.mxu2 %v2129_v29 }
 0x6c1   : > { %1966 = vmatmul.f32.vlgmr.msrb.gmra.mxu3 %v1865_v44  ;;  %v1866_v45 = vsub.f32 %v1864_v43, %v1865_v44 }
 0x6c2   : > { %2203 = vmatpush.msrb.mxu1 %v2102_v30  ;;  %2232 = vmatpush.msrb.mxu2 %v2135_v1 }
 0x6c3   : > { %v1867_v46 = vand.u32 4294901760, %v1866_v45  ;;  %2259 = vmatpush.msrb.mxu3 %v2098_v58 }
 0x6c4   : > { %2205 = vmatpush.msrb.mxu1 %v2104_v3  ;;  %2236 = vmatpush.msrb.mxu2 %v2141_v15 }
 0x6c5   : > { %1868 = vmatmul.f32.vlgmr.msrb.gmra.mxu0 %v1867_v46  ;;  %2024 = vmatmul.f32.vlgmr.msra.gmra.mxu1 %v1863_v53 }
 0x6c6   : > { %2170 = vmatpush.msrb.mxu0 %v2128_v59  ;;  %2240 = vmatpush.msrb.mxu2 %v2147_v21 }
 0x6c7   : > { %2261 = vmatpush.msrb.mxu3 %v2100_v13 }
 0x6c8   : > { %2173 = vmatpush.msrb.mxu0 %v2134_v11 }
 0x6c9   : > { %2263 = vmatpush.msrb.mxu3 %v2102_v30 }
 0x6ca   : > { %2176 = vmatpush.msrb.mxu0 %v2140_v2 }
 0x6cb   : > { %2265 = vmatpush.msrb.mxu3 %v2104_v3 }
 0x6cc   : > { %2179 = vmatpush.msrb.mxu0 %v2146_v16 }
 0x6cd   : > { %1999 = vmatmul.f32.vlgmr.msra.gmra.mxu0 %v1863_v53 }
 0x73a   : > { %v1910_v4 = vpop.f32.mrf.mxu1 }
 0x742   : > { %v1869_v5 = vpop.f32.mrf.mxu0  ;;  %v1940_v50 = vpop.f32.mrf.mxu2 }
 0x743   : > { %v1870_v48 = vadd.f32 %v1869_v5, %v1827_v55  ;;  %v2025_v56 = vpop.f32.mrf.mxu1 }
 0x744   : > { %v1967_v51 = vpop.f32.mrf.mxu3 }
 0x745   : > { %v1911_v49 = vadd.f32 %v1910_v4, %v1870_v48  ;;  %v2520_v4 = vld [vmem:[#allocation2 + $0x8] sm:$0xff] }
 0x746   : > { %v2066_v5 = vperm.slane %v2520_v4, 2  ;;  %v2070_v57 = vperm.slane %v2520_v4, 4 }
 0x747   : > { %v1941_v20 = vadd.f32 %v1940_v50, %v1911_v49  ;;  %v2068_v50 = vperm.slane %v2520_v4, 3 }
 0x749   : > { %v1968_v9 = vadd.f32 %v1967_v51, %v1941_v20 }
 0x74a   : > { %v2000_v7 = vpop.f32.mrf.mxu0 }
 0x74b   : > { %v2001_v10 = vadd.f32 %v2000_v7, %v1968_v9 }
 0x74d   : > { %v2026_v52 = vadd.f32 %v2025_v56, %v2001_v10 }
 0x74f   : > { %v2028_v8 = vsel %vm1077_vm3, %v2026_v52, 0.0 }
 0x750   : > { %2029 = vadd.xlane.f32.xlu1 %v2028_v8 }
 0x7c3   : > { %v2030_v18 = vpop.xlane.xlu1 %2029 }
 0x7c4   : > { %v2031_v60 = vmul.f32 %v2030_v18, %v2832_v54 }
 0x7c6   : > { %v3052_v61 = vsub.f32 %v2026_v52, %v2031_v60 }
 0x7c8   : > { %v2033_v17 = vmul.f32 %v3052_v61, %v3052_v61 }
 0x7ca   : > { %v2034_v63 = vsel %vm1077_vm3, %v2033_v17, 0.0 }
 0x7cb   : > { %2035 = vadd.xlane.f32.xlu2 %v2034_v63 }
 0x83e   : > { %v2036_v27 = vpop.xlane.xlu2 %2035 }
 0x83f   : > { %v2037_v28 = vmul.f32 %v2036_v27, %v2832_v54 }
 0x841   : > { %v2038_v32 = vadd.f32 1e-05, %v2037_v28 }
 0x843   : > { %2516 = vrsqrt.f32 %v2038_v32  ;;  %vm2046_vm3 = vcmp.eq.f32.partialorder %v2038_v32, inf  ;;  %v2049_v38 = vand.u32 2147483648, %v2038_v32  ;;  %vm2048_vm0 = vcmp.eq.f32.partialorder %v2038_v32, 0.0 }
 0x849   : > { %v2517_v33 = vpop.eup %2516 }
 0x84a   : > { %v2040_v34 = vmul.f32 %v2517_v33, %v2038_v32 }
 0x84c   : > { %v2041_v62 = vmul.f32 %v2517_v33, %v2040_v34 }
 0x84e   : > { %v2042_v36 = vmul.f32 0.5, %v2041_v62 }
 0x850   : > { %v2043_v47 = vsub.f32 1.5, %v2042_v36 }
 0x852   : > { %v2044_v37 = vmul.f32 %v2517_v33, %v2043_v47 }
 0x854   : > { %v2045_v31 = vmul.f32 %v2044_v37, %v2038_v32 }
 0x856   : > { %v2047_v39 = vsel %vm2046_vm3, %v2038_v32, %v2045_v31 }
 0x857   : > { %v2050_v40 = vsel %vm2048_vm0, %v2049_v38, %v2047_v39 }
 0x858   : > { %2518 = vrcp.f32 %v2050_v40  ;;  %v2062_v53 = vand.u32 2147483648, %v2050_v40  ;;  %v2060_v44 = vand.u32 2147483647, %v2050_v40  ;;  %vm2056_vm4 = vweird.f32 %v2050_v40 }
 0x85a   : > { %v2063_v46 = vor.u32 1.1754944e-38, %v2062_v53  ;;  %vm2061_vm6 = vcmp.eq.f32.partialorder %v2060_v44, 8.507059e+37 }
 0x85e   : > { %v2519_v41 = vpop.eup %2518 }
 0x85f   : > { %v2052_v42 = vmul.f32 %v2519_v41, %v2050_v40  ;;  %vm2057_vm2 = vweird.f32 %v2519_v41 }
 0x860   : > { %vm2058_vm5 = vmor %vm2056_vm4, %vm2057_vm2 }
 0x861   : > { %v2053_v54 = vsub.f32 1.0, %v2052_v42 }
 0x863   : > { %v2054_v43 = vmul.f32 %v2519_v41, %v2053_v54 }
 0x865   : > { %v2055_v45 = vadd.f32 %v2519_v41, %v2054_v43 }
 0x867   : > { %v2059_v55 = vsel %vm2058_vm5, %v2519_v41, %v2055_v45 }
 0x868   : > { %v2064_v48 = vsel %vm2061_vm6, %v2063_v46, %v2059_v55 }
 0x869   : > { %v2065_v49 = vmul.f32 %v2064_v48, %v3052_v61 }
 0x86b   : > { %v2067_v20 = vmul.f32 %v2066_v5, %v2065_v49 }
 0x86d   : > { %v2069_v51 = vadd.f32 %v2068_v50, %v2067_v20 }
 0x86f   : > { %v2084_v9 = vsel %vm533_vm1, %v2069_v51, 0 }
 0x870   : > { %v2106_v7 = vand.u32 4294901760, %v2084_v9 }
 0x872   : > { %2152 = vmatmul.f32.vlgmr.msra.gmra.mxu3 %v2106_v7  ;;  %v2107_v10 = vsub.f32 %v2084_v9, %v2106_v7 }
 0x874   : > { %2182 = vmatmul.f32.vlgmr.msrb.gmra.mxu0 %v2107_v10  ;;  %v2108_v56 = vand.u32 4294901760, %v2107_v10 }
 0x876   : > { %2209 = vmatmul.f32.vlgmr.msrb.gmra.mxu1 %v2108_v56  ;;  %v2109_v52 = vsub.f32 %v2107_v10, %v2108_v56 }
 0x878   : > { %v2110_v8 = vand.u32 4294901760, %v2109_v52 }
 0x87a   : > { %2111 = vmatmul.f32.vlgmr.msra.gmra.mxu2 %v2110_v8  ;;  %2267 = vmatmul.f32.vlgmr.msrb.gmra.mxu3 %v2106_v7 }
 0x882   : > { %2242 = vmatmul.f32.vlgmr.msrb.gmra.mxu2 %v2106_v7 }
 0x8f1   : > { %v2183_v14 = vpop.f32.mrf.mxu0 }
 0x8f3   : > { %v2210_v60 = vpop.f32.mrf.mxu1 }
 0x8f5   : > { %v2153_v58 = vpop.f32.mrf.mxu3 }
 0x8fd   : > { %v2112_v59 = vpop.f32.mrf.mxu2  ;;  %v2268_v0 = vpop.f32.mrf.mxu3 }
 0x8fe   : > { %v2113_v29 = vadd.f32 %v2112_v59, %v2070_v57 }
 0x900   : > { %v2154_v6 = vadd.f32 %v2153_v58, %v2113_v29 }
 0x902   : > { %v2184_v18 = vadd.f32 %v2183_v14, %v2154_v6 }
 0x904   : > { %v2211_v61 = vadd.f32 %v2210_v60, %v2184_v18 }
 0x905   : > { %v2243_v17 = vpop.f32.mrf.mxu2 }
 0x906   : > { %v2244_v63 = vadd.f32 %v2243_v17, %v2211_v61 }
 0x908   : > { %v2269_v12 = vadd.f32 %v2268_v0, %v2244_v63 }
 0x90a   : > { %v2276_v13 = vrot.slane %v2269_v12, 2  ;;  %v2272_v11 = vrot.slane %v2269_v12, 1  ;;  %v2280_v30 = vrot.slane %v2269_v12, 3 }
 0x90c   : > { %2277 = vrot.lane.b32.xlu1 %v2276_v13, %s2692_s9  ;;  %2273 = vrot.lane.b32.xlu0 %v2272_v11, %s2690_s8 }
 0x914   : > { %2281 = vrot.lane.b32.xlu0 %v2280_v30, %s2689_s29  ;;  %s2631_s29 = scalar_lea.hbm %s3103_s7, 2 }
 0x915   : > { %p2633_p4 = scmp.lt.s32.totalorder %s2631_s29, %s2627_s23 }
 0x917   : > { %p2634_p7 = por %p2633_p4, %p2632_p3 }
 0x919   : > { %p2635_p8 = pnand %p2634_p7, %p2630_p2 }
 0x97e   : > { %v2274_v35 = vpop.permute.xlu0 %2273  ;;  %v2278_v1 = vpop.permute.xlu1 %2277 }
 0x97f   : > { %v2284_v2 = vsel %vm533_vm1, %v2269_v12, %v2274_v35 }
 0x980   : > { %v2286_v3 = vsel %vm2285_vm7, %v2284_v2, %v2278_v1 }
 0x986   : > { %v2282_v15 = vpop.permute.xlu0 %2281 }
 0x987   : > { %v2288_v16 = vsel %vm2287_vm8, %v2286_v3, %v2282_v15 }
 0x988   : > { %2289 = vst [vmem:[%s329_s20] sm:$0x1] %v2288_v16 }
 0x989   : > { %2638 = shalt.err (!%p2635_p8)
}
 0x98a   : > { %2429 = dma.vmem_to_hbm [thread:$0]  (%p2771_p5), %s2302_s13, 16, %s2304_s18, %s2291_s21  }
 0x98b PF: > { %p2451_p9 = scmp.ge.s32.totalorder %s2681_s27, 2  ;;  %s2315_s14 = sand.u32 1, %s2669_s24  }
 0x98c   : > { %s2316_s15 = scalar_lea.sflag [#allocation4], %s2315_s14 }
 0x98d   : > { %p2442_p10 = pnand %p2451_p9, %p2775_p6 }
 0x98f   : > { %p2443_p11 = pneg %p2442_p10 }
 0x991   : > { %2664 = dma.done.wait (%p2443_p11), %s2316_s15, 16  }
 0x992   : > { %2666 = vsyncadd (%p2443_p11), %s2316_s15, 4294967280  ;;  %p19_p12 = scmp.ge.s32.totalorder %s2758_s30, 4   ;;  %s3108_s24 = smov %s2673_s25 }
 0x993   : > { %s3109_s25 = smov %s2677_s26  ;;  %s3110_s26 = smov %s2769_s10 }
 0x994   : > { %s3111_s27 = smov %s2758_s30  ;;  %21 = sbr.rel (!%p19_p12) target bundleno = 5 (0x5), region = 99 }
 0x999   :  { %2321 = vsyncpa [#allocation3], 1 }
 0x99a   :  { %2323 = vsyncpa [#allocation3 + $0x1], 1 }
 0x99b   :  { %2324 = vsyncpa [#allocation6], 1 }
 0x99c   :  { %2325 = vsyncpa [#allocation4], 1 }
 0x99d   :  { %2327 = vsyncpa [#allocation4 + $0x1], 1 }

</bundles_post_ra>
